<compile_context>
chip_gen: v6e
topology: v6e:2x2x1
jax: 0.10.0
libtpu: 0.0.40
codegen_flags: <defaults>
</compile_context>

<pallas_src>
import math
import numpy as np

import jax
import jax.numpy as jnp
from jax.experimental import pallas as pl
from jax.experimental.pallas import tpu as pltpu

# ---- config (the "conf" object of the PyTorch module) ----
C_S = 32        # conf.c_s
C_HIDDEN = 8    # conf.c_hidden
NO_HEADS = 4    # conf.no_heads
HC = C_HIDDEN * NO_HEADS
INF = 100000.0  # self.inf
ROPE_THETA = 10000.0
SCALE = math.sqrt(1.0 / (3.0 * C_HIDDEN))

HIGHEST = jax.lax.Precision.HIGHEST


def _self_attention_kernel(s_ref, mrow_ref, mcol_ref, cs_ref,
                           wcat_ref, wout_ref, bout_ref, out_ref):
    """Whole (B, N) problem in one grid step.

    s_ref:    [B, N, c_s]
    mrow_ref: [B, N, 1]      row mask (1=keep, 0=pad)
    mcol_ref: [B, 1, N]      same mask, key-side layout
    cs_ref:   [B, N, 2*C]    packed rotary tables: [cos | sin]
    wcat_ref: [H, c_s, 5*C]  [Wq*scale | rot(Wq*scale) | Wk | rot(Wk) | Wv]
    wout_ref: [H, C, c_s]
    bout_ref: [1, c_s]
    out_ref:  [B, N, c_s]
    """
    B, N, CS = s_ref.shape
    H, C, _ = wout_ref.shape
    M = B * N  # all rows stacked on the sublane axis

    s = s_ref[...].reshape(M, CS)
    cs = cs_ref[...].reshape(M, 2 * C)
    cos = cs[:, :C]          # [M, C]
    sin = cs[:, C:]          # [M, C]

    # One head-batched projection for everything: [H, M, 5*C].
    s_b = jnp.broadcast_to(s[None], (H, M, CS))
    r = jnp.einsum('hms,hsc->hmc', s_b, wcat_ref[...],
                   preferred_element_type=jnp.float32, precision=HIGHEST)

    # Static lane slices (width C=8) of the 40-wide result.
    q = r[..., 0 * C:1 * C]        # already scaled by SCALE (folded host-side)
    q_sw = r[..., 1 * C:2 * C]     # rotate_half(q), scaled
    k = r[..., 2 * C:3 * C]
    k_sw = r[..., 3 * C:4 * C]
    v = r[..., 4 * C:5 * C]

    # Rotary: x*cos + rotate_half(x)*sin (rotate_half folded into W_cat).
    q = q * cos + q_sw * sin       # [H, M, C]
    k = k * cos + k_sw * sin

    # Attention with batch dim = (head, batch element).
    qb = q.reshape(H * B, N, C)
    kb = k.reshape(H * B, N, C)
    vb = v.reshape(H * B, N, C)

    a = jnp.einsum('bqc,bkc->bqk', qb, kb,
                   preferred_element_type=jnp.float32, precision=HIGHEST)

    # Additive soft mask, built on the VPU from the [B, N] masks.
    bias = INF * (mrow_ref[...] * mcol_ref[...] - 1.0)        # [B, N, N]
    a = (a.reshape(H, B, N, N) + bias).reshape(H * B, N, N)

    # Softmax over keys (exact divide — approx reciprocal failed tolerance).
    a = a - jnp.max(a, axis=-1, keepdims=True)
    p = jnp.exp(a)
    p = p / jnp.sum(p, axis=-1, keepdims=True)

    o = jnp.einsum('bqk,bkc->bqc', p, vb,
                   preferred_element_type=jnp.float32, precision=HIGHEST)

    # Output projection with the head-concat folded in (per-head slab of W_out),
    # then head-sum.
    o = o.reshape(H, M, C)
    y = jnp.einsum('hmc,hcs->hms', o, wout_ref[...],
                   preferred_element_type=jnp.float32, precision=HIGHEST)
    y = jnp.sum(y, axis=0) + bout_ref[...]                    # [M, c_s]
    out_ref[...] = y.reshape(B, N, CS).astype(out_ref.dtype)


def _rotary_tables(ridx):
    """cos/sin per (batch, position, head-channel), interleaved pairs (GPT-J)."""
    inv_freq = 1.0 / (ROPE_THETA ** (jnp.arange(0, C_HIDDEN, 2, dtype=jnp.float32)
                                     / C_HIDDEN))
    freqs = ridx.astype(jnp.float32)[..., None] * inv_freq    # [B, N, C/2]
    emb = jnp.repeat(freqs, 2, axis=-1)                       # [B, N, C] (f0,f0,f1,f1,..)
    return jnp.cos(emb), jnp.sin(emb)


def _rotate_half_cols(x):
    """rotate_half applied along the last axis: out[2i]=-x[2i+1], out[2i+1]=x[2i]."""
    x1 = x[..., 0::2]
    x2 = x[..., 1::2]
    return jnp.stack([-x2, x1], axis=-1).reshape(x.shape)


def self_attention(s, ridx, mask, params):
    """s: [B, N, c_s] f32, ridx: [B, N] int, mask: [B, N] f32 (1=keep, 0=pad)."""
    B, N, _ = s.shape

    # Packed rotary tables: [B, N, 2*C] = [cos | sin].
    cos, sin = _rotary_tables(ridx)
    cs = jnp.concatenate([cos, sin], axis=-1)

    # Host-side (free) weight re-blocking + concat + SCALE folding.
    wq = params["wq"].reshape(C_S, NO_HEADS, C_HIDDEN).transpose(1, 0, 2) * SCALE
    wkv = params["wkv"].reshape(C_S, NO_HEADS, 2 * C_HIDDEN).transpose(1, 0, 2)
    wk = wkv[..., :C_HIDDEN]
    wv = wkv[..., C_HIDDEN:]
    wcat = jnp.concatenate(
        [wq, _rotate_half_cols(wq), wk, _rotate_half_cols(wk), wv], axis=-1)
    # wcat: [H, c_s, 5*C]
    wout_h = params["wout"].reshape(NO_HEADS, C_HIDDEN, C_S)   # [H, C, c_s]

    mask_row = mask[:, :, None].astype(jnp.float32)            # [B, N, 1]
    mask_col = mask[:, None, :].astype(jnp.float32)            # [B, 1, N]

    full3 = lambda b: (0, 0, 0)
    return pl.pallas_call(
        _self_attention_kernel,
        out_shape=jax.ShapeDtypeStruct((B, N, C_S), jnp.float32),
        grid_spec=pltpu.PrefetchScalarGridSpec(
            num_scalar_prefetch=0,
            grid=(1,),
            in_specs=[
                pl.BlockSpec((B, N, C_S), full3),                         # s
                pl.BlockSpec((B, N, 1), full3),                           # mask (rows)
                pl.BlockSpec((B, 1, N), full3),                           # mask (cols)
                pl.BlockSpec((B, N, 2 * C_HIDDEN), full3),                # cos|sin
                pl.BlockSpec((NO_HEADS, C_S, 5 * C_HIDDEN), full3),       # W_cat
                pl.BlockSpec((NO_HEADS, C_HIDDEN, C_S), full3),           # W_out
                pl.BlockSpec((1, C_S), lambda b: (0, 0)),                 # b_out
            ],
            out_specs=pl.BlockSpec((B, N, C_S), full3),
        ),
        compiler_params=pltpu.CompilerParams(dimension_semantics=("arbitrary",)),
    )(s, mask_row, mask_col, cs, wcat, wout_h, params["bout"])


def reference(s, ridx, mask, params):
    """Pure-JAX mirror of the PyTorch forward (norm_qk=False, ct=None)."""
    B, N, _ = s.shape
    q = jnp.einsum('bns,sh->bnh', s, params["wq"], precision=HIGHEST)
    kv = jnp.einsum('bns,sh->bnh', s, params["wkv"], precision=HIGHEST)
    q = q.reshape(B, N, NO_HEADS, C_HIDDEN)
    kv = kv.reshape(B, N, NO_HEADS, 2 * C_HIDDEN)
    k, v = kv[..., :C_HIDDEN], kv[..., C_HIDDEN:]

    cos, sin = _rotary_tables(ridx)
    cos = cos[:, :, None, :]
    sin = sin[:, :, None, :]
    q = q * cos + _rotate_half_cols(q) * sin
    k = k * cos + _rotate_half_cols(k) * sin

    bias = INF * (mask[:, :, None] * mask[:, None, :] - 1.0)
    a = jnp.einsum('bqhc,bkhc->bhqk', q, k, precision=HIGHEST) * SCALE
    a = a + bias[:, None, :, :]
    a = jax.nn.softmax(a, axis=-1)
    o = jnp.einsum('bhqk,bkhc->bqhc', a, v, precision=HIGHEST).reshape(B, N, HC)
    return jnp.einsum('bnh,hs->bns', o, params["wout"], precision=HIGHEST) + params["bout"]


if __name__ == "__main__":
    B, N = 2, 8
    key = jax.random.PRNGKey(0)
    k1, k2, k3, k4, k5 = jax.random.split(key, 5)

    s = jax.random.normal(k1, (B, N, C_S), jnp.float32)
    ridx = jnp.tile(jnp.arange(N, dtype=jnp.int32)[None, :], (B, 1))
    lengths = jnp.array([8, 6], jnp.int32)
    mask = (jnp.arange(N, dtype=jnp.int32)[None, :] < lengths[:, None]).astype(jnp.float32)

    params = {
        "wq": jax.random.normal(k2, (C_S, HC), jnp.float32) / math.sqrt(C_S),
        "wkv": jax.random.normal(k3, (C_S, 2 * HC), jnp.float32) / math.sqrt(C_S),
        "wout": jax.random.normal(k4, (HC, C_S), jnp.float32) / math.sqrt(HC),
        "bout": 0.01 * jax.random.normal(k5, (1, C_S), jnp.float32),
    }

    out = jax.block_until_ready(self_attention(s, ridx, mask, params))
    ref = reference(s, ridx, mask, params)

    assert out.shape == (B, N, C_S)
    np.testing.assert_allclose(np.asarray(out), np.asarray(ref), atol=1e-4, rtol=1e-4)
    print("KERNEL_OK")
</pallas_src>

<mosaic_0001>
module attributes {stable_mosaic.version = 11 : i64} {
  func.func @_self_attention_kernel(%arg0: i32, %arg1: memref<2x8x32xf32, #tpu.memory_space<vmem>>, %arg2: memref<2x8x1xf32, #tpu.memory_space<vmem>>, %arg3: memref<2x1x8xf32, #tpu.memory_space<vmem>>, %arg4: memref<2x8x16xf32, #tpu.memory_space<vmem>>, %arg5: memref<4x32x40xf32, #tpu.memory_space<vmem>>, %arg6: memref<4x8x32xf32, #tpu.memory_space<vmem>>, %arg7: memref<1x32xf32, #tpu.memory_space<vmem>>, %arg8: memref<2x8x32xf32, #tpu.memory_space<vmem>>) attributes {dimension_semantics = [#tpu.dimension_semantics<arbitrary>], iteration_bounds = array<i64: 1>, scalar_prefetch = 0 : i64, scratch_operands = 0 : i64, tpu.core_type = #tpu.core_type<tc>, window_params = [{pipeline_mode = #tpu.pipeline_mode<synchronous>, transform_indices = @transform_0, window_bounds = array<i64: 2, 8, 32>}, {pipeline_mode = #tpu.pipeline_mode<synchronous>, transform_indices = @transform_1, window_bounds = array<i64: 2, 8, 1>}, {pipeline_mode = #tpu.pipeline_mode<synchronous>, transform_indices = @transform_2, window_bounds = array<i64: 2, 1, 8>}, {pipeline_mode = #tpu.pipeline_mode<synchronous>, transform_indices = @transform_3, window_bounds = array<i64: 2, 8, 16>}, {pipeline_mode = #tpu.pipeline_mode<synchronous>, transform_indices = @transform_4, window_bounds = array<i64: 4, 32, 40>}, {pipeline_mode = #tpu.pipeline_mode<synchronous>, transform_indices = @transform_5, window_bounds = array<i64: 4, 8, 32>}, {pipeline_mode = #tpu.pipeline_mode<synchronous>, transform_indices = @transform_6, window_bounds = array<i64: 1, 32>}, {pipeline_mode = #tpu.pipeline_mode<synchronous>, transform_indices = @transform_7, window_bounds = array<i64: 2, 8, 32>}]} {
    %c0 = arith.constant 0 : index
    %c0_0 = arith.constant 0 : index
    %c0_1 = arith.constant 0 : index
    %0 = vector.load %arg1[%c0, %c0_0, %c0_1] : memref<2x8x32xf32, #tpu.memory_space<vmem>>, vector<2x8x32xf32>
    %1 = vector.shape_cast %0 : vector<2x8x32xf32> to vector<16x32xf32>
    %c0_2 = arith.constant 0 : index
    %c0_3 = arith.constant 0 : index
    %c0_4 = arith.constant 0 : index
    %2 = vector.load %arg4[%c0_2, %c0_3, %c0_4] : memref<2x8x16xf32, #tpu.memory_space<vmem>>, vector<2x8x16xf32>
    %3 = vector.shape_cast %2 : vector<2x8x16xf32> to vector<16x16xf32>
    %4 = vector.extract_strided_slice %3 {offsets = [0, 0], sizes = [16, 8], strides = [1, 1]} : vector<16x16xf32> to vector<16x8xf32>
    %5 = vector.extract_strided_slice %3 {offsets = [0, 8], sizes = [16, 8], strides = [1, 1]} : vector<16x16xf32> to vector<16x8xf32>
    %6 = vector.shape_cast %1 : vector<16x32xf32> to vector<1x16x32xf32>
    %7 = vector.shape_cast %6 : vector<1x16x32xf32> to vector<1x16x32xf32>
    %8 = vector.broadcast %7 : vector<1x16x32xf32> to vector<4x16x32xf32>
    %c0_5 = arith.constant 0 : index
    %c0_6 = arith.constant 0 : index
    %c0_7 = arith.constant 0 : index
    %9 = vector.load %arg5[%c0_5, %c0_6, %c0_7] : memref<4x32x40xf32, #tpu.memory_space<vmem>>, vector<4x32x40xf32>
    "tpu.trace_start"() <{level = 10 : i32, message = "hms,hsc->hmc"}> : () -> ()
    %cst = arith.constant dense<0.000000e+00> : vector<4x16x40xf32>
    %10 = tpu.matmul %8, %9, %cst {dimension_numbers = #tpu.dot_dimension_numbers<[2], [1], [1], [2], [0, 0, 0, 1, 1, 2], [0], [0]>, precision = #tpu.contract_precision<fp32>} : vector<4x16x32xf32>, vector<4x32x40xf32>, vector<4x16x40xf32> -> vector<4x16x40xf32>
    "tpu.trace_stop"() : () -> ()
    %11 = vector.extract_strided_slice %10 {offsets = [0, 0, 0], sizes = [4, 16, 8], strides = [1, 1, 1]} : vector<4x16x40xf32> to vector<4x16x8xf32>
    %12 = vector.extract_strided_slice %10 {offsets = [0, 0, 8], sizes = [4, 16, 8], strides = [1, 1, 1]} : vector<4x16x40xf32> to vector<4x16x8xf32>
    %13 = vector.extract_strided_slice %10 {offsets = [0, 0, 16], sizes = [4, 16, 8], strides = [1, 1, 1]} : vector<4x16x40xf32> to vector<4x16x8xf32>
    %14 = vector.extract_strided_slice %10 {offsets = [0, 0, 24], sizes = [4, 16, 8], strides = [1, 1, 1]} : vector<4x16x40xf32> to vector<4x16x8xf32>
    %15 = vector.extract_strided_slice %10 {offsets = [0, 0, 32], sizes = [4, 16, 8], strides = [1, 1, 1]} : vector<4x16x40xf32> to vector<4x16x8xf32>
    %16 = vector.shape_cast %4 : vector<16x8xf32> to vector<1x16x8xf32>
    %17 = vector.broadcast %16 : vector<1x16x8xf32> to vector<4x16x8xf32>
    %18 = arith.mulf %11, %17 : vector<4x16x8xf32>
    %19 = vector.shape_cast %5 : vector<16x8xf32> to vector<1x16x8xf32>
    %20 = vector.broadcast %19 : vector<1x16x8xf32> to vector<4x16x8xf32>
    %21 = arith.mulf %12, %20 : vector<4x16x8xf32>
    %22 = arith.addf %18, %21 : vector<4x16x8xf32>
    %23 = vector.shape_cast %4 : vector<16x8xf32> to vector<1x16x8xf32>
    %24 = vector.broadcast %23 : vector<1x16x8xf32> to vector<4x16x8xf32>
    %25 = arith.mulf %13, %24 : vector<4x16x8xf32>
    %26 = vector.shape_cast %5 : vector<16x8xf32> to vector<1x16x8xf32>
    %27 = vector.broadcast %26 : vector<1x16x8xf32> to vector<4x16x8xf32>
    %28 = arith.mulf %14, %27 : vector<4x16x8xf32>
    %29 = arith.addf %25, %28 : vector<4x16x8xf32>
    %30 = vector.shape_cast %22 : vector<4x16x8xf32> to vector<8x8x8xf32>
    %31 = vector.shape_cast %29 : vector<4x16x8xf32> to vector<8x8x8xf32>
    %32 = vector.shape_cast %15 : vector<4x16x8xf32> to vector<8x8x8xf32>
    "tpu.trace_start"() <{level = 10 : i32, message = "bqc,bkc->bqk"}> : () -> ()
    %cst_8 = arith.constant dense<0.000000e+00> : vector<8x8x8xf32>
    %33 = tpu.matmul %30, %31, %cst_8 {dimension_numbers = #tpu.dot_dimension_numbers<[2], [2], [1], [1], [0, 0, 0, 1, 1, 1], [0], [0]>, precision = #tpu.contract_precision<fp32>} : vector<8x8x8xf32>, vector<8x8x8xf32>, vector<8x8x8xf32> -> vector<8x8x8xf32>
    "tpu.trace_stop"() : () -> ()
    %c0_9 = arith.constant 0 : index
    %c0_10 = arith.constant 0 : index
    %c0_11 = arith.constant 0 : index
    %34 = vector.load %arg2[%c0_9, %c0_10, %c0_11] : memref<2x8x1xf32, #tpu.memory_space<vmem>>, vector<2x8x1xf32>
    %c0_12 = arith.constant 0 : index
    %c0_13 = arith.constant 0 : index
    %c0_14 = arith.constant 0 : index
    %35 = vector.load %arg3[%c0_12, %c0_13, %c0_14] : memref<2x1x8xf32, #tpu.memory_space<vmem>>, vector<2x1x8xf32>
    %36 = vector.broadcast %34 : vector<2x8x1xf32> to vector<2x8x8xf32>
    %37 = vector.broadcast %35 : vector<2x1x8xf32> to vector<2x8x8xf32>
    %38 = arith.mulf %36, %37 : vector<2x8x8xf32>
    %cst_15 = arith.constant 1.000000e+00 : f32
    %39 = vector.broadcast %cst_15 : f32 to vector<2x8x8xf32>
    %40 = arith.subf %38, %39 : vector<2x8x8xf32>
    %cst_16 = arith.constant 1.000000e+05 : f32
    %41 = vector.broadcast %cst_16 : f32 to vector<2x8x8xf32>
    %42 = arith.mulf %41, %40 : vector<2x8x8xf32>
    %43 = vector.shape_cast %33 : vector<8x8x8xf32> to vector<4x2x8x8xf32>
    %44 = vector.shape_cast %42 : vector<2x8x8xf32> to vector<1x2x8x8xf32>
    %45 = vector.broadcast %44 : vector<1x2x8x8xf32> to vector<4x2x8x8xf32>
    %46 = arith.addf %43, %45 : vector<4x2x8x8xf32>
    %47 = vector.shape_cast %46 : vector<4x2x8x8xf32> to vector<8x8x8xf32>
    %cst_17 = arith.constant dense<0xFF800000> : vector<8x8xf32>
    %48 = vector.multi_reduction <maximumf>, %47, %cst_17 [2] : vector<8x8x8xf32> to vector<8x8xf32>
    %49 = vector.shape_cast %48 : vector<8x8xf32> to vector<8x8x1xf32>
    %50 = vector.broadcast %49 : vector<8x8x1xf32> to vector<8x8x8xf32>
    %51 = arith.subf %47, %50 : vector<8x8x8xf32>
    %52 = math.exp %51 : vector<8x8x8xf32>
    %cst_18 = arith.constant dense<0.000000e+00> : vector<8x8xf32>
    %53 = vector.multi_reduction <add>, %52, %cst_18 [2] : vector<8x8x8xf32> to vector<8x8xf32>
    %54 = vector.shape_cast %53 : vector<8x8xf32> to vector<8x8x1xf32>
    %55 = vector.broadcast %54 : vector<8x8x1xf32> to vector<8x8x8xf32>
    %56 = arith.divf %52, %55 : vector<8x8x8xf32>
    "tpu.trace_start"() <{level = 10 : i32, message = "bqk,bkc->bqc"}> : () -> ()
    %cst_19 = arith.constant dense<0.000000e+00> : vector<8x8x8xf32>
    %57 = tpu.matmul %56, %32, %cst_19 {dimension_numbers = #tpu.dot_dimension_numbers<[2], [1], [1], [2], [0, 0, 0, 1, 1, 2], [0], [0]>, precision = #tpu.contract_precision<fp32>} : vector<8x8x8xf32>, vector<8x8x8xf32>, vector<8x8x8xf32> -> vector<8x8x8xf32>
    "tpu.trace_stop"() : () -> ()
    %58 = vector.shape_cast %57 : vector<8x8x8xf32> to vector<4x16x8xf32>
    %c0_20 = arith.constant 0 : index
    %c0_21 = arith.constant 0 : index
    %c0_22 = arith.constant 0 : index
    %59 = vector.load %arg6[%c0_20, %c0_21, %c0_22] : memref<4x8x32xf32, #tpu.memory_space<vmem>>, vector<4x8x32xf32>
    "tpu.trace_start"() <{level = 10 : i32, message = "hmc,hcs->hms"}> : () -> ()
    %cst_23 = arith.constant dense<0.000000e+00> : vector<4x16x32xf32>
    %60 = tpu.matmul %58, %59, %cst_23 {dimension_numbers = #tpu.dot_dimension_numbers<[2], [1], [1], [2], [0, 0, 0, 1, 1, 2], [0], [0]>, precision = #tpu.contract_precision<fp32>} : vector<4x16x8xf32>, vector<4x8x32xf32>, vector<4x16x32xf32> -> vector<4x16x32xf32>
    "tpu.trace_stop"() : () -> ()
    %cst_24 = arith.constant dense<0.000000e+00> : vector<16x32xf32>
    %61 = vector.multi_reduction <add>, %60, %cst_24 [0] : vector<4x16x32xf32> to vector<16x32xf32>
    %c0_25 = arith.constant 0 : index
    %c0_26 = arith.constant 0 : index
    %62 = vector.load %arg7[%c0_25, %c0_26] : memref<1x32xf32, #tpu.memory_space<vmem>>, vector<1x32xf32>
    %63 = vector.broadcast %62 : vector<1x32xf32> to vector<16x32xf32>
    %64 = arith.addf %61, %63 : vector<16x32xf32>
    %65 = vector.shape_cast %64 : vector<16x32xf32> to vector<2x8x32xf32>
    %c0_27 = arith.constant 0 : index
    %c0_28 = arith.constant 0 : index
    %c0_29 = arith.constant 0 : index
    %66 = vector.load %arg8[%c0_27, %c0_28, %c0_29] : memref<2x8x32xf32, #tpu.memory_space<vmem>>, vector<2x8x32xf32>
    tpu.vector_store %arg8[%c0_27, %c0_28, %c0_29], %65 {strides = array<i32>} : memref<2x8x32xf32, #tpu.memory_space<vmem>>, vector<2x8x32xf32>,
    return
  }
  func.func @transform_0(%arg0: i32) -> (i32, i32, i32) {
    %c0_i32 = arith.constant 0 : i32
    %c0_i32_0 = arith.constant 0 : i32
    %c0_i32_1 = arith.constant 0 : i32
    %c0_i32_2 = arith.constant 0 : i32
    return %c0_i32, %c0_i32_0, %c0_i32_1 : i32, i32, i32
  }
  func.func @transform_1(%arg0: i32) -> (i32, i32, i32) {
    %c0_i32 = arith.constant 0 : i32
    %c0_i32_0 = arith.constant 0 : i32
    %c0_i32_1 = arith.constant 0 : i32
    %c0_i32_2 = arith.constant 0 : i32
    return %c0_i32, %c0_i32_0, %c0_i32_1 : i32, i32, i32
  }
  func.func @transform_2(%arg0: i32) -> (i32, i32, i32) {
    %c0_i32 = arith.constant 0 : i32
    %c0_i32_0 = arith.constant 0 : i32
    %c0_i32_1 = arith.constant 0 : i32
    %c0_i32_2 = arith.constant 0 : i32
    return %c0_i32, %c0_i32_0, %c0_i32_1 : i32, i32, i32
  }
  func.func @transform_3(%arg0: i32) -> (i32, i32, i32) {
    %c0_i32 = arith.constant 0 : i32
    %c0_i32_0 = arith.constant 0 : i32
    %c0_i32_1 = arith.constant 0 : i32
    %c0_i32_2 = arith.constant 0 : i32
    return %c0_i32, %c0_i32_0, %c0_i32_1 : i32, i32, i32
  }
  func.func @transform_4(%arg0: i32) -> (i32, i32, i32) {
    %c0_i32 = arith.constant 0 : i32
    %c0_i32_0 = arith.constant 0 : i32
    %c0_i32_1 = arith.constant 0 : i32
    %c0_i32_2 = arith.constant 0 : i32
    return %c0_i32, %c0_i32_0, %c0_i32_1 : i32, i32, i32
  }
  func.func @transform_5(%arg0: i32) -> (i32, i32, i32) {
    %c0_i32 = arith.constant 0 : i32
    %c0_i32_0 = arith.constant 0 : i32
    %c0_i32_1 = arith.constant 0 : i32
    %c0_i32_2 = arith.constant 0 : i32
    return %c0_i32, %c0_i32_0, %c0_i32_1 : i32, i32, i32
  }
  func.func @transform_6(%arg0: i32) -> (i32, i32) {
    %c0_i32 = arith.constant 0 : i32
    %c0_i32_0 = arith.constant 0 : i32
    %c0_i32_1 = arith.constant 0 : i32
    return %c0_i32, %c0_i32_0 : i32, i32
  }
  func.func @transform_7(%arg0: i32) -> (i32, i32, i32) {
    %c0_i32 = arith.constant 0 : i32
    %c0_i32_0 = arith.constant 0 : i32
    %c0_i32_1 = arith.constant 0 : i32
    %c0_i32_2 = arith.constant 0 : i32
    return %c0_i32, %c0_i32_0, %c0_i32_1 : i32, i32, i32
  }
}

</mosaic_0001>

<bundles_post_ra>
// kernel: tpu_custom_call.1
= control target key start
LH: loop header
LB: loop body
LE: loop exit
PB: predicated region body
PF: predicated region fallthrough
CT: control target
= control target key end

     0   :  { %12 = vsyncpa [#allocation3], 0  ;;  %s14412_s0 = inlined_call_operand.vmem [shape: f32[2,8,32], index: 0, kind: input, shape index: {}]   ;;  %s14413_s1 = inlined_call_operand.vmem [shape: f32[2,8,1], index: 1, kind: input, shape index: {}]   ;;  %s14414_s2 = inlined_call_operand.vmem [shape: f32[2,1,8], index: 2, kind: input, shape index: {}]   ;;  %s14415_s3 = inlined_call_operand.hbm [shape: f32[2,8,16], index: 3, kind: input, shape index: {}]   ;;  %s14416_s4 = inlined_call_operand.hbm [shape: f32[4,32,40], index: 4, kind: input, shape index: {}]   ;;  %s14417_s5 = inlined_call_operand.hbm [shape: f32[4,8,32], index: 5, kind: input, shape index: {}]   ;;  %s14418_s6 = inlined_call_operand.vmem [shape: f32[1,32], index: 6, kind: input, shape index: {}]   ;;  %s14419_s7 = inlined_call_operand.hbm [shape: f32[2,8,32], index: 7, kind: output, shape index: {}]  }
   0x1   :  { %13 = vsyncpa [#allocation6], 0 }
   0x2   :  { %14 = vsyncpa [#allocation4], 0  ;;  %s13133_s24 = smov [#allocation5]   ;;  %s13134_s26 = smov [#allocation2]  }
   0x3   :  { %s38_s25 = sshll.u32 %s13133_s24, 4  ;;  %s26_s27 = sshll.u32 %s13134_s26, 4  ;;  %s39_s25 = int_to_ptr.vmem [resolvable:$true] %s38_s25  ;;  %s27_s27 = int_to_ptr.vmem [resolvable:$true] %s26_s27 }
   0x4   :  { %s13055_s28 = scalar_lea.vmem %s39_s25, 2048  ;;  %p13060_p1 = scmp.lt.s32.totalorder %s39_s25, %s39_s25 }
   0x5   :  { %p13056_p0 = scmp.ne.s32.totalorder %s39_s25, %s13055_s28  ;;  %p13061_p2 = scmp.lt.s32.totalorder %s13055_s28, %s13055_s28 }
   0x7   :  { %p13062_p3 = por %p13061_p2, %p13060_p1 }
   0x9   :  { %p13063_p4 = pnand %p13062_p3, %p13056_p0 }
   0xb   :  { %13066 = shalt.err (!%p13063_p4)
}
   0xc   :  { %s13135_s29 = smov 128   ;;  %s13136_s30 = smov 8  }
   0xd   :  { %44 = dma.hbm_to_vmem [thread:$0]  %s14416_s4, 2048, %s39_s25, [#allocation6], %s13135_s29, %s13135_s29, %s13136_s30  }
   0xe   :  { %s13075_s10 = scalar_lea.vmem %s27_s27, 256  ;;  %p13080_p6 = scmp.lt.s32.totalorder %s27_s27, %s27_s27 }
   0xf   :  { %p13076_p5 = scmp.ne.s32.totalorder %s27_s27, %s13075_s10  ;;  %p13081_p7 = scmp.lt.s32.totalorder %s13075_s10, %s13075_s10 }
  0x11   :  { %p13082_p8 = por %p13081_p7, %p13080_p6 }
  0x13   :  { %p13083_p9 = pnand %p13082_p8, %p13076_p5 }
  0x15   :  { %13086 = shalt.err (!%p13083_p9)
}
  0x16   :  { %32 = dma.hbm_to_vmem [thread:$0]  %s14415_s3, 256, %s27_s27, [#allocation3], %s13135_s29, %s13135_s29, %s13136_s30  }
  0x17   :  { %s13137_s13 = smov [#allocation7]  }
  0x18   :  { %s50_s14 = sshll.u32 %s13137_s13, 4  ;;  %s51_s14 = int_to_ptr.vmem [resolvable:$true] %s50_s14 }
  0x19   :  { %s13095_s15 = scalar_lea.vmem %s51_s14, 512  ;;  %p13100_p11 = scmp.lt.s32.totalorder %s51_s14, %s51_s14 }
  0x1a   :  { %p13096_p10 = scmp.ne.s32.totalorder %s51_s14, %s13095_s15  ;;  %p13101_p12 = scmp.lt.s32.totalorder %s13095_s15, %s13095_s15 }
  0x1c   :  { %p13102_p13 = por %p13101_p12, %p13100_p11 }
  0x1e   :  { %p13103_p0 = pnand %p13102_p13, %p13096_p10 }
  0x20   :  { %13106 = shalt.err (!%p13103_p0)
}
  0x21   :  { %56 = dma.hbm_to_vmem [thread:$0]  %s14417_s5, 512, %s51_s14, [#allocation6], %s13135_s29, %s13135_s29, %s13136_s30  }
  0x22   :  { %13127 = dma.done.wait [#allocation3], 256  }
  0x23   :  { %13128 = vsyncadd [#allocation3], 4294967040 }
  0x24   :  { %13129 = dma.done.wait [#allocation6], 2560  }
  0x25   :  { %13130 = vsyncadd [#allocation6], 4294964736  ;;  %vm88_vm0 = vcmask 261120   ;;  %v75_v0 = vld [vmem:[#allocation5 + $0x18] sm:$0xff]  ;;  %v74_v1 = vld [vmem:[#allocation5 + $0x10] sm:$0xff]  ;;  %s13139_s19 = smov 120  }
  0x26   :  { %v73_v2 = vld [vmem:[#allocation5 + $0x8] sm:$0xff]  ;;  %v13204_v3 = vand.u32 4294901760, %v75_v0  ;;  %v13206_v4 = vand.u32 4294901760, %v74_v1  ;;  %v72_v6 = vld [vmem:[#allocation5] sm:$0xff]  ;;  %v68_v7 = vld [vmem:[%s14412_s0] sm:$0xff]  ;;  %s13141_s20 = smov 112  }
  0x27   :  { %v13208_v5 = vand.u32 4294901760, %v73_v2  ;;  %v69_v8 = vld [vmem:[%s14412_s0 + $0x8] sm:$0xff]  ;;  %v13216_v9 = vand.u32 4294901760, %v72_v6  ;;  %v90_v10 = vsel %vm88_vm0, %v68_v7, 0  ;;  %v13247_v24 = vld [vmem:[#allocation2] sm:$0xff]  ;;  %s13138_s0 = smov 16  }
  0x28   :  { %v93_v11 = vsel %vm88_vm0, %v69_v8, 0  ;;  %12136 = vmatprep.subr.mxu0 %v13204_v3  ;;  %v210_v12 = vsub.f32 %v75_v0, %v13204_v3  ;;  %v13222_v13 = vand.u32 4294901760, %v90_v10  ;;  %v217_v14 = vsub.f32 %v74_v1, %v13206_v4  ;;  %2257 = vrot.lane.b32.xlu0 %v13247_v24, %s13138_s0  ;;  %v13267_v35 = vld [vmem:[#allocation2 + $0x8] sm:$0xff]  ;;  %v78_v41 = vld [vmem:[#allocation5 + $0x30] sm:$0xff]  ;;  %v77_v43 = vld [vmem:[#allocation5 + $0x28] sm:$0xff]  ;;  %s13145_s9 = smov [#allocation8]  }
  0x29   :  { %v13225_v15 = vand.u32 4294901760, %v93_v11  ;;  %12137 = vmatpush3.msra.mxu0 %v13204_v3  ;;  %v224_v16 = vsub.f32 %v73_v2, %v13208_v5  ;;  %v231_v17 = vsub.f32 %v72_v6, %v13216_v9  ;;  %v79_v40 = vld [vmem:[#allocation5 + $0x38] sm:$0xff]  ;;  %v13282_v44 = vand.u32 4294901760, %v78_v41  ;;  %v76_v45 = vld [vmem:[#allocation5 + $0x20] sm:$0xff]  ;;  %v82_v1 = vld [vmem:[#allocation5 + $0x50] sm:$0xff]  ;;  %s11710_s10 = sshll.u32 %s13145_s9, 4  ;;  %s11711_s10 = int_to_ptr.vmem [resolvable:$true] %s11710_s10 }
  0x2a   :  { %12138 = vmatprep.subr.mxu0 %v13206_v4  ;;  %v13231_v18 = vand.u32 4294901760, %v210_v12  ;;  %v13234_v19 = vsub.f32 %v90_v10, %v13222_v13  ;;  %v13236_v20 = vand.u32 4294901760, %v217_v14  ;;  %12155 = vmatprep.mubr.f32.mxu1 %v13222_v13  ;;  %v13278_v42 = vand.u32 4294901760, %v79_v40  ;;  %v83_v0 = vld [vmem:[#allocation5 + $0x58] sm:$0xff]  ;;  %s13107_s11 = scalar_lea.vmem %s11711_s10, 256  ;;  %p13112_p2 = scmp.lt.s32.totalorder %s11711_s10, %s11711_s10 }
  0x2b   :  { %v13239_v21 = vsub.f32 %v93_v11, %v13225_v15  ;;  %12139 = vmatpush3.msra.mxu0 %v13206_v4  ;;  %v13243_v22 = vand.u32 4294901760, %v224_v16  ;;  %v13245_v23 = vand.u32 4294901760, %v231_v17  ;;  %v13291_v47 = vand.u32 4294901760, %v77_v43  ;;  %p13108_p1 = scmp.ne.s32.totalorder %s11711_s10, %s13107_s11  ;;  %p13113_p3 = scmp.lt.s32.totalorder %s13107_s11, %s13107_s11 }
  0x2c   :  { %12140 = vmatprep.subr.mxu0 %v13208_v5  ;;  %v212_v25 = vsub.f32 %v210_v12, %v13231_v18  ;;  %v13252_v26 = vand.u32 4294901760, %v13234_v19  ;;  %v219_v27 = vsub.f32 %v217_v14, %v13236_v20  ;;  %2259 = vrot.lane.b32.xlu0 %v13267_v35, %s13138_s0  ;;  %v13289_v46 = vsub.f32 %v79_v40, %v13278_v42 }
  0x2d   :  { %v13256_v28 = vand.u32 4294901760, %v13239_v21  ;;  %12141 = vmatpush3.msra.mxu0 %v13208_v5  ;;  %v226_v29 = vsub.f32 %v224_v16, %v13243_v22  ;;  %v233_v30 = vsub.f32 %v231_v17, %v13245_v23  ;;  %v13298_v48 = vsub.f32 %v78_v41, %v13282_v44  ;;  %p13114_p4 = por %p13113_p3, %p13112_p2 }
  0x2e   :  { %12142 = vmatprep.subr.mxu0 %v13216_v9  ;;  %v213_v31 = vand.u32 4294901760, %v212_v25  ;;  %v167_v32 = vsub.f32 %v13234_v19, %v13252_v26  ;;  %v220_v33 = vand.u32 4294901760, %v219_v27  ;;  %v13300_v49 = vand.u32 4294901760, %v76_v45 }
  0x2f   :  { %v177_v34 = vsub.f32 %v13239_v21, %v13256_v28  ;;  %12143 = vmatpush3.msra.mxu0 %v13216_v9  ;;  %v227_v38 = vand.u32 4294901760, %v226_v29  ;;  %v234_v39 = vand.u32 4294901760, %v233_v30  ;;  %v13307_v50 = vand.u32 4294901760, %v13289_v46  ;;  %p13115_p5 = pnand %p13114_p4, %p13108_p1 }
  0x30   :  { %12147 = vmatprep.subr.mxu1 %v213_v31  ;;  %v13270_v36 = vand.u32 4294901760, %v167_v32  ;;  %12158 = vmatprep.subr.mxu0 %v210_v12  ;;  %v13310_v51 = vsub.f32 %v77_v43, %v13291_v47  ;;  %v13317_v52 = vand.u32 4294901760, %v13298_v48  ;;  %v13320_v53 = vsub.f32 %v76_v45, %v13300_v49  ;;  %v86_v32 = vld [vmem:[#allocation5 + $0x70] sm:$0xff] }
  0x31   :  { %v13272_v37 = vand.u32 4294901760, %v177_v34  ;;  %12148 = vmatpush3.msra.mxu1 %v213_v31  ;;  %v740_v54 = vsub.f32 %v13289_v46, %v13307_v50  ;;  %v13366_v2 = vand.u32 4294901760, %v83_v0  ;;  %v87_v31 = vld [vmem:[#allocation5 + $0x78] sm:$0xff]  ;;  %v85_v34 = vld [vmem:[#allocation5 + $0x68] sm:$0xff]  ;;  %vm13142_vm1 = vmmov 0  }
  0x32   :  { %12144 = vmatprep.mubr.f32.mxu0 %v13270_v36  ;;  %12149 = vmatprep.subr.mxu1 %v220_v33  ;;  %v13329_v55 = vand.u32 4294901760, %v13310_v51  ;;  %v747_v56 = vsub.f32 %v13298_v48, %v13317_v52  ;;  %v13338_v57 = vand.u32 4294901760, %v13320_v53  ;;  %v13473_v41 = vand.u32 4294901760, %v85_v34 }
  0x33   :  { %12145 = vmatmul.mubr.f32.vlgmr.msra.gmra.mxu0 %v13272_v37  ;;  %12150 = vmatpush3.msra.mxu1 %v220_v33  ;;  %v741_v58 = vand.u32 4294901760, %v740_v54  ;;  %v13379_v6 = vsub.f32 %v83_v0, %v13366_v2  ;;  %v13458_v33 = vand.u32 4294901760, %v87_v31  ;;  %vm2314_vm2 = vcmask 64512  }
  0x34   :  { %12159 = vmatpush3.msra.mxu0 %v210_v12  ;;  %12151 = vmatprep.subr.mxu1 %v227_v38  ;;  %v754_v59 = vsub.f32 %v13310_v51, %v13329_v55  ;;  %v748_v60 = vand.u32 4294901760, %v747_v56  ;;  %v761_v61 = vsub.f32 %v13320_v53, %v13338_v57  ;;  %v1808_v45 = vsub.f32 %v85_v34, %v13473_v41 }
  0x35   :  { %12160 = vmatprep.subr.mxu0 %v217_v14  ;;  %12152 = vmatpush3.msra.mxu1 %v227_v38  ;;  %v13397_v10 = vand.u32 4294901760, %v13379_v6  ;;  %v13464_v38 = vand.u32 4294901760, %v86_v32  ;;  %v13471_v40 = vsub.f32 %v87_v31, %v13458_v33 }
  0x36   :  { %12161 = vmatpush3.msra.mxu0 %v217_v14  ;;  %12153 = vmatprep.subr.mxu1 %v234_v39  ;;  %v755_v62 = vand.u32 4294901760, %v754_v59  ;;  %v762_v63 = vand.u32 4294901760, %v761_v61 }
  0x37   :  { %12162 = vmatprep.subr.mxu0 %v224_v16  ;;  %12154 = vmatpush3.msra.mxu1 %v234_v39  ;;  %v84_v39 = vld [vmem:[#allocation5 + $0x60] sm:$0xff] }
  0x38   :  { %12163 = vmatpush3.msra.mxu0 %v224_v16  ;;  %12156 = vmatmul.mubr.f32.vlgmr.msra.gmra.mxu1 %v13225_v15  ;;  %v1268_v16 = vsub.f32 %v13379_v6, %v13397_v10  ;;  %v13482_v43 = vand.u32 4294901760, %v84_v39 }
  0x39   :  { %12164 = vmatprep.subr.mxu0 %v231_v17  ;;  %12169 = vmatprep.subr.mxu1 %v13204_v3 }
  0x3a   :  { %12165 = vmatpush3.msra.mxu0 %v231_v17  ;;  %12166 = vmatprep.mubr.f32.mxu0 %v13234_v19 }
  0x3b   :  { %12170 = vmatpush3.msra.mxu1 %v13204_v3  ;;  %12167 = vmatmul.mubr.f32.vlgmr.msra.gmra.mxu0 %v13239_v21 }
  0x3c   :  { %12171 = vmatprep.subr.mxu1 %v13206_v4  ;;  %12180 = vmatprep.subr.mxu0 %v13231_v18 }
  0x3d   :  { %12172 = vmatpush3.msra.mxu1 %v13206_v4  ;;  %12181 = vmatpush3.msra.mxu0 %v13231_v18 }
  0x3e   :  { %12173 = vmatprep.subr.mxu1 %v13208_v5  ;;  %12182 = vmatprep.subr.mxu0 %v13236_v20 }
  0x3f   :  { %12174 = vmatpush3.msra.mxu1 %v13208_v5  ;;  %12183 = vmatpush3.msra.mxu0 %v13236_v20 }
  0x40   :  { %12175 = vmatprep.subr.mxu1 %v13216_v9  ;;  %12184 = vmatprep.subr.mxu0 %v13243_v22 }
  0x41   :  { %12176 = vmatpush3.msra.mxu1 %v13216_v9  ;;  %12177 = vmatprep.mubr.f32.mxu1 %v13252_v26 }
  0x42   :  { %12185 = vmatpush3.msra.mxu0 %v13243_v22  ;;  %12178 = vmatmul.mubr.f32.vlgmr.msra.gmra.mxu1 %v13256_v28  ;;  %v1269_v22 = vand.u32 4294901760, %v1268_v16 }
  0x43   :  { %12186 = vmatprep.subr.mxu0 %v13245_v23  ;;  %12191 = vmatprep.subr.mxu1 %v13204_v3 }
  0x44   :  { %12187 = vmatpush3.msra.mxu0 %v13245_v23  ;;  %12188 = vmatprep.mubr.f32.mxu0 %v13222_v13 }
  0x45   :  { %12192 = vmatpush3.msra.mxu1 %v13204_v3  ;;  %12189 = vmatmul.mubr.f32.vlgmr.msra.gmra.mxu0 %v13225_v15  ;;  %v81_v3 = vld [vmem:[#allocation5 + $0x48] sm:$0xff] }
  0x46   :  { %12193 = vmatprep.subr.mxu1 %v13206_v4  ;;  %12202 = vmatprep.subr.mxu0 %v13278_v42  ;;  %v13381_v7 = vand.u32 4294901760, %v81_v3 }
  0x47   :  { %12194 = vmatpush3.msra.mxu1 %v13206_v4  ;;  %12199 = vmatprep.mubr.f32.mxu1 %v13222_v13  ;;  %v13372_v4 = vand.u32 4294901760, %v82_v1 }
  0x48   :  { %12195 = vmatprep.subr.mxu1 %v13208_v5  ;;  %12203 = vmatpush3.msra.mxu0 %v13278_v42  ;;  %v13400_v11 = vsub.f32 %v81_v3, %v13381_v7 }
  0x49   :  { %12196 = vmatpush3.msra.mxu1 %v13208_v5  ;;  %12204 = vmatprep.subr.mxu0 %v13282_v44  ;;  %v80_v5 = vld [vmem:[#allocation5 + $0x40] sm:$0xff]  ;;  %v13388_v8 = vsub.f32 %v82_v1, %v13372_v4 }
  0x4a   :  { %12197 = vmatprep.subr.mxu1 %v13216_v9  ;;  %12205 = vmatpush3.msra.mxu0 %v13282_v44  ;;  %v13419_v17 = vand.u32 4294901760, %v13400_v11 }
  0x4b   :  { %12198 = vmatpush3.msra.mxu1 %v13216_v9  ;;  %12206 = vmatprep.subr.mxu0 %v13291_v47  ;;  %v13390_v9 = vand.u32 4294901760, %v80_v5  ;;  %v13407_v12 = vand.u32 4294901760, %v13388_v8 }
  0x4c   :  { %12200 = vmatmul.mubr.f32.vlgmr.msra.gmra.mxu1 %v13225_v15  ;;  %12213 = vmatprep.subr.mxu1 %v741_v58  ;;  %v1282_v23 = vsub.f32 %v13400_v11, %v13419_v17 }
  0x4d   :  { %12214 = vmatpush3.msra.mxu1 %v741_v58  ;;  %12207 = vmatpush3.msra.mxu0 %v13291_v47  ;;  %v13410_v14 = vsub.f32 %v80_v5, %v13390_v9  ;;  %v1275_v18 = vsub.f32 %v13388_v8, %v13407_v12 }
  0x4e   :  { %12215 = vmatprep.subr.mxu1 %v748_v60  ;;  %12208 = vmatprep.subr.mxu0 %v13300_v49  ;;  %v1283_v29 = vand.u32 4294901760, %v1282_v23 }
  0x4f   :  { %12216 = vmatpush3.msra.mxu1 %v748_v60  ;;  %12209 = vmatpush3.msra.mxu0 %v13300_v49  ;;  %v13428_v20 = vand.u32 4294901760, %v13410_v14  ;;  %v1276_v25 = vand.u32 4294901760, %v1275_v18 }
  0x50   :  { %12217 = vmatprep.subr.mxu1 %v755_v62  ;;  %12210 = vmatprep.mubr.f32.mxu0 %v13270_v36 }
  0x51   :  { %12218 = vmatpush3.msra.mxu1 %v755_v62  ;;  %12224 = vmatprep.subr.mxu0 %v13289_v46  ;;  %v1289_v27 = vsub.f32 %v13410_v14, %v13428_v20 }
  0x52   :  { %12219 = vmatprep.subr.mxu1 %v762_v63  ;;  %12211 = vmatmul.mubr.f32.vlgmr.msra.gmra.mxu0 %v13272_v37 }
  0x53   :  { %12220 = vmatpush3.msra.mxu1 %v762_v63  ;;  %12225 = vmatpush3.msra.mxu0 %v13289_v46  ;;  %v1290_v30 = vand.u32 4294901760, %v1289_v27 }
  0x54   :  { %12221 = vmatprep.mubr.f32.mxu1 %v13222_v13  ;;  %12226 = vmatprep.subr.mxu0 %v13298_v48 }
  0x55   :  { %12235 = vmatprep.subr.mxu1 %v13278_v42  ;;  %12222 = vmatmul.mubr.f32.vlgmr.msra.gmra.mxu1 %v13225_v15 }
  0x56   :  { %12227 = vmatpush3.msra.mxu0 %v13298_v48  ;;  %12236 = vmatpush3.msra.mxu1 %v13278_v42 }
  0x57   :  { %12228 = vmatprep.subr.mxu0 %v13310_v51  ;;  %12237 = vmatprep.subr.mxu1 %v13282_v44 }
  0x58   :  { %12229 = vmatpush3.msra.mxu0 %v13310_v51  ;;  %12238 = vmatpush3.msra.mxu1 %v13282_v44 }
  0x59   :  { %12230 = vmatprep.subr.mxu0 %v13320_v53  ;;  %12239 = vmatprep.subr.mxu1 %v13291_v47 }
  0x5a   :  { %12231 = vmatpush3.msra.mxu0 %v13320_v53  ;;  %12240 = vmatpush3.msra.mxu1 %v13291_v47 }
  0x5b   :  { %12232 = vmatprep.mubr.f32.mxu0 %v13234_v19  ;;  %12241 = vmatprep.subr.mxu1 %v13300_v49 }
  0x5c   :  { %12246 = vmatprep.subr.mxu0 %v13307_v50  ;;  %12233 = vmatmul.mubr.f32.vlgmr.msra.gmra.mxu0 %v13239_v21 }
  0x5d   :  { %12242 = vmatpush3.msra.mxu1 %v13300_v49  ;;  %12247 = vmatpush3.msra.mxu0 %v13307_v50 }
  0x5e   :  { %12243 = vmatprep.mubr.f32.mxu1 %v13252_v26  ;;  %12248 = vmatprep.subr.mxu0 %v13317_v52 }
  0x5f   :  { %12257 = vmatprep.subr.mxu1 %v13278_v42  ;;  %12244 = vmatmul.mubr.f32.vlgmr.msra.gmra.mxu1 %v13256_v28 }
  0x60   :  { %12249 = vmatpush3.msra.mxu0 %v13317_v52  ;;  %12258 = vmatpush3.msra.mxu1 %v13278_v42  ;;  %v13480_v42 = vsub.f32 %v86_v32, %v13464_v38 }
  0x61   :  { %12250 = vmatprep.subr.mxu0 %v13329_v55  ;;  %12259 = vmatprep.subr.mxu1 %v13282_v44 }
  0x62   :  { %12251 = vmatpush3.msra.mxu0 %v13329_v55  ;;  %12260 = vmatpush3.msra.mxu1 %v13282_v44  ;;  %v13489_v44 = vand.u32 4294901760, %v13471_v40  ;;  %v13497_v46 = vand.u32 4294901760, %v13480_v42 }
  0x63   :  { %12252 = vmatprep.subr.mxu0 %v13338_v57  ;;  %12261 = vmatprep.subr.mxu1 %v13291_v47 }
  0x64   :  { %12253 = vmatpush3.msra.mxu0 %v13338_v57  ;;  %12254 = vmatprep.mubr.f32.mxu0 %v13222_v13  ;;  %v1796_v48 = vsub.f32 %v13471_v40, %v13489_v44  ;;  %v1803_v50 = vsub.f32 %v13480_v42, %v13497_v46 }
  0x65   :  { %12262 = vmatpush3.msra.mxu1 %v13291_v47  ;;  %12255 = vmatmul.mubr.f32.vlgmr.msra.gmra.mxu0 %v13225_v15  ;;  %v1815_v47 = vsub.f32 %v84_v39, %v13482_v43 }
  0x66   :  { %12263 = vmatprep.subr.mxu1 %v13300_v49  ;;  %12268 = vmatprep.subr.mxu0 %v13366_v2  ;;  %v1797_v52 = vand.u32 4294901760, %v1796_v48  ;;  %v1804_v54 = vand.u32 4294901760, %v1803_v50 }
  0x67   :  { %12264 = vmatpush3.msra.mxu1 %v13300_v49  ;;  %12265 = vmatprep.mubr.f32.mxu1 %v13222_v13  ;;  %v13506_v49 = vand.u32 4294901760, %v1808_v45  ;;  %v13514_v51 = vand.u32 4294901760, %v1815_v47 }
  0x68   :  { %12269 = vmatpush3.msra.mxu0 %v13366_v2  ;;  %12266 = vmatmul.mubr.f32.vlgmr.msra.gmra.mxu1 %v13225_v15 }
  0x69   :  { %12270 = vmatprep.subr.mxu0 %v13372_v4  ;;  %12279 = vmatprep.subr.mxu1 %v1269_v22  ;;  %v1810_v53 = vsub.f32 %v1808_v45, %v13506_v49  ;;  %v1817_v55 = vsub.f32 %v1815_v47, %v13514_v51 }
  0x6a   :  { %12271 = vmatpush3.msra.mxu0 %v13372_v4  ;;  %12280 = vmatpush3.msra.mxu1 %v1269_v22 }
  0x6b   :  { %12272 = vmatprep.subr.mxu0 %v13381_v7  ;;  %12281 = vmatprep.subr.mxu1 %v1276_v25  ;;  %v1811_v56 = vand.u32 4294901760, %v1810_v53  ;;  %v1818_v57 = vand.u32 4294901760, %v1817_v55 }
  0x6c   :  { %12273 = vmatpush3.msra.mxu0 %v13381_v7  ;;  %12282 = vmatpush3.msra.mxu1 %v1276_v25 }
  0x6d   :  { %12274 = vmatprep.subr.mxu0 %v13390_v9  ;;  %12283 = vmatprep.subr.mxu1 %v1283_v29 }
  0x6e   :  { %12275 = vmatpush3.msra.mxu0 %v13390_v9  ;;  %12284 = vmatpush3.msra.mxu1 %v1283_v29 }
  0x6f   :  { %12276 = vmatprep.mubr.f32.mxu0 %v13270_v36  ;;  %12285 = vmatprep.subr.mxu1 %v1290_v30 }
  0x70   :  { %12290 = vmatprep.subr.mxu0 %v13379_v6  ;;  %12277 = vmatmul.mubr.f32.vlgmr.msra.gmra.mxu0 %v13272_v37 }
  0x71   :  { %12286 = vmatpush3.msra.mxu1 %v1290_v30  ;;  %12291 = vmatpush3.msra.mxu0 %v13379_v6 }
  0x72   :  { %12287 = vmatprep.mubr.f32.mxu1 %v13222_v13  ;;  %12292 = vmatprep.subr.mxu0 %v13388_v8 }
  0x73   :  { %12301 = vmatprep.subr.mxu1 %v13366_v2  ;;  %12288 = vmatmul.mubr.f32.vlgmr.msra.gmra.mxu1 %v13225_v15 }
  0x74   :  { %12293 = vmatpush3.msra.mxu0 %v13388_v8  ;;  %12302 = vmatpush3.msra.mxu1 %v13366_v2 }
  0x75   :  { %12294 = vmatprep.subr.mxu0 %v13400_v11  ;;  %12303 = vmatprep.subr.mxu1 %v13372_v4 }
  0x76   :  { %12295 = vmatpush3.msra.mxu0 %v13400_v11  ;;  %12304 = vmatpush3.msra.mxu1 %v13372_v4 }
  0x77   :  { %12296 = vmatprep.subr.mxu0 %v13410_v14  ;;  %12305 = vmatprep.subr.mxu1 %v13381_v7 }
  0x78   :  { %12297 = vmatpush3.msra.mxu0 %v13410_v14  ;;  %12306 = vmatpush3.msra.mxu1 %v13381_v7 }
  0x79   :  { %12298 = vmatprep.mubr.f32.mxu0 %v13234_v19  ;;  %12307 = vmatprep.subr.mxu1 %v13390_v9 }
  0x7a   :  { %12312 = vmatprep.subr.mxu0 %v13397_v10  ;;  %12299 = vmatmul.mubr.f32.vlgmr.msra.gmra.mxu0 %v13239_v21 }
  0x7b   :  { %12308 = vmatpush3.msra.mxu1 %v13390_v9  ;;  %12313 = vmatpush3.msra.mxu0 %v13397_v10 }
  0x7c   :  { %12309 = vmatprep.mubr.f32.mxu1 %v13252_v26  ;;  %12314 = vmatprep.subr.mxu0 %v13407_v12 }
  0x7d   :  { %12323 = vmatprep.subr.mxu1 %v13366_v2  ;;  %12310 = vmatmul.mubr.f32.vlgmr.msra.gmra.mxu1 %v13256_v28 }
  0x7e   :  { %12315 = vmatpush3.msra.mxu0 %v13407_v12  ;;  %12324 = vmatpush3.msra.mxu1 %v13366_v2 }
  0x7f   :  { %12316 = vmatprep.subr.mxu0 %v13419_v17  ;;  %12325 = vmatprep.subr.mxu1 %v13372_v4 }
  0x80   :  { %12317 = vmatpush3.msra.mxu0 %v13419_v17  ;;  %12326 = vmatpush3.msra.mxu1 %v13372_v4 }
  0x81   :  { %12318 = vmatprep.subr.mxu0 %v13428_v20  ;;  %12327 = vmatprep.subr.mxu1 %v13381_v7 }
  0x82   :  { %12319 = vmatpush3.msra.mxu0 %v13428_v20  ;;  %12320 = vmatprep.mubr.f32.mxu0 %v13222_v13 }
  0x83   :  { %12328 = vmatpush3.msra.mxu1 %v13381_v7  ;;  %12321 = vmatmul.mubr.f32.vlgmr.msra.gmra.mxu0 %v13225_v15 }
  0x84   :  { %12329 = vmatprep.subr.mxu1 %v13390_v9  ;;  %12334 = vmatprep.subr.mxu0 %v13458_v33 }
  0x85   :  { %12330 = vmatpush3.msra.mxu1 %v13390_v9  ;;  %12331 = vmatprep.mubr.f32.mxu1 %v13222_v13 }
  0x86   :  { %12335 = vmatpush3.msra.mxu0 %v13458_v33  ;;  %12332 = vmatmul.mubr.f32.vlgmr.msra.gmra.mxu1 %v13225_v15 }
  0x87   :  { %12336 = vmatprep.subr.mxu0 %v13464_v38  ;;  %12345 = vmatprep.subr.mxu1 %v1797_v52 }
  0x88   :  { %12337 = vmatpush3.msra.mxu0 %v13464_v38  ;;  %12346 = vmatpush3.msra.mxu1 %v1797_v52 }
  0x89   :  { %12338 = vmatprep.subr.mxu0 %v13473_v41  ;;  %12347 = vmatprep.subr.mxu1 %v1804_v54 }
  0x8a   :  { %12339 = vmatpush3.msra.mxu0 %v13473_v41  ;;  %12348 = vmatpush3.msra.mxu1 %v1804_v54 }
  0x8b   :  { %12340 = vmatprep.subr.mxu0 %v13482_v43  ;;  %12349 = vmatprep.subr.mxu1 %v1811_v56 }
  0x8c   :  { %12341 = vmatpush3.msra.mxu0 %v13482_v43  ;;  %12350 = vmatpush3.msra.mxu1 %v1811_v56 }
  0x8d   :  { %12342 = vmatprep.mubr.f32.mxu0 %v13270_v36  ;;  %12351 = vmatprep.subr.mxu1 %v1818_v57 }
  0x8e   :  { %12356 = vmatprep.subr.mxu0 %v13471_v40  ;;  %12343 = vmatmul.mubr.f32.vlgmr.msra.gmra.mxu0 %v13272_v37 }
  0x8f   :  { %12352 = vmatpush3.msra.mxu1 %v1818_v57  ;;  %12357 = vmatpush3.msra.mxu0 %v13471_v40 }
  0x90   :  { %12353 = vmatprep.mubr.f32.mxu1 %v13222_v13  ;;  %12358 = vmatprep.subr.mxu0 %v13480_v42 }
  0x91   :  { %12367 = vmatprep.subr.mxu1 %v13458_v33  ;;  %12354 = vmatmul.mubr.f32.vlgmr.msra.gmra.mxu1 %v13225_v15 }
  0x92   :  { %12359 = vmatpush3.msra.mxu0 %v13480_v42  ;;  %12368 = vmatpush3.msra.mxu1 %v13458_v33 }
  0x93   :  { %12360 = vmatprep.subr.mxu0 %v1808_v45  ;;  %12369 = vmatprep.subr.mxu1 %v13464_v38 }
  0x94   :  { %12361 = vmatpush3.msra.mxu0 %v1808_v45  ;;  %12370 = vmatpush3.msra.mxu1 %v13464_v38 }
  0x95   :  { %12362 = vmatprep.subr.mxu0 %v1815_v47  ;;  %12371 = vmatprep.subr.mxu1 %v13473_v41 }
  0x96   :  { %12363 = vmatpush3.msra.mxu0 %v1815_v47  ;;  %12372 = vmatpush3.msra.mxu1 %v13473_v41 }
  0x97   :  { %12364 = vmatprep.mubr.f32.mxu0 %v13234_v19  ;;  %12373 = vmatprep.subr.mxu1 %v13482_v43 }
  0x98   :  { %12378 = vmatprep.subr.mxu0 %v13489_v44  ;;  %12365 = vmatmul.mubr.f32.vlgmr.msra.gmra.mxu0 %v13239_v21 }
  0x99   :  { %12374 = vmatpush3.msra.mxu1 %v13482_v43  ;;  %12379 = vmatpush3.msra.mxu0 %v13489_v44 }
  0x9a   :  { %12375 = vmatprep.mubr.f32.mxu1 %v13252_v26  ;;  %12380 = vmatprep.subr.mxu0 %v13497_v46  ;;  %v13574_v3 = vpop.permute.xlu0 %2257 }
  0x9b   :  { %12389 = vmatprep.subr.mxu1 %v13458_v33  ;;  %12376 = vmatmul.mubr.f32.vlgmr.msra.gmra.mxu1 %v13256_v28 }
  0x9c   :  { %12381 = vmatpush3.msra.mxu0 %v13497_v46  ;;  %12390 = vmatpush3.msra.mxu1 %v13458_v33 }
  0x9d   :  { %12382 = vmatprep.subr.mxu0 %v13506_v49  ;;  %12391 = vmatprep.subr.mxu1 %v13464_v38 }
  0x9e   :  { %12383 = vmatpush3.msra.mxu0 %v13506_v49  ;;  %12392 = vmatpush3.msra.mxu1 %v13464_v38  ;;  %v13584_v10 = vpop.permute.xlu0 %2259 }
  0x9f   :  { %12384 = vmatprep.subr.mxu0 %v13514_v51  ;;  %12393 = vmatprep.subr.mxu1 %v13473_v41 }
  0xa0   :  { %12385 = vmatpush3.msra.mxu0 %v13514_v51  ;;  %12386 = vmatprep.mubr.f32.mxu0 %v13222_v13 }
  0xa1   :  { %12394 = vmatpush3.msra.mxu1 %v13473_v41  ;;  %12387 = vmatmul.mubr.f32.vlgmr.msra.gmra.mxu0 %v13225_v15 }
  0xa2   :  { %12395 = vmatprep.subr.mxu1 %v13482_v43  ;;  %12397 = vmatprep.mubr.f32.mxu1 %v13222_v13 }
  0xa3   :  { %12396 = vmatpush3.msra.mxu1 %v13482_v43 }
  0xa4   :  { %12398 = vmatmul.mubr.f32.vlgmr.msra.gmra.mxu1 %v13225_v15 }
  0xf3   :  { %v12146_v19 = vpop.f32.mrf.mxu0 }
  0xf5   :  { %v170_v21 = vpop.f32.mrf.mxu0 }
  0xf8   :  { %v12157_v26 = vpop.f32.mrf.mxu1 }
  0xf9   :  { %v278_v60 = vadd.f32 %v12157_v26, %v12146_v19 }
  0xfa   :  { %v271_v28 = vpop.f32.mrf.mxu1 }
  0xfb   :  { %v12168_v36 = vpop.f32.mrf.mxu0  ;;  %v272_v58 = vadd.f32 %v271_v28, %v170_v21 }
  0xfc   :  { %v365_v0 = vadd.f32 %v12168_v36, %v278_v60 }
  0xfd   :  { %v357_v59 = vpop.f32.mrf.mxu0 }
  0xfe   :  { %v358_v63 = vadd.f32 %v357_v59, %v272_v58 }
 0x102   :  { %v12179_v37 = vpop.f32.mrf.mxu1 }
 0x103   :  { %v450_v13 = vadd.f32 %v12179_v37, %v365_v0 }
 0x104   :  { %v441_v61 = vpop.f32.mrf.mxu1 }
 0x105   :  { %v12190_v62 = vpop.f32.mrf.mxu0  ;;  %v442_v1 = vadd.f32 %v441_v61, %v358_v63 }
 0x106   :  { %v539_v6 = vadd.f32 %v12190_v62, %v450_v13 }
 0x107   :  { %v532_v2 = vpop.f32.mrf.mxu0 }
 0x108   :  { %v533_v15 = vadd.f32 %v532_v2, %v442_v1 }
 0x10c   :  { %v12201_v4 = vpop.f32.mrf.mxu1 }
 0x10d   :  { %v13578_v8 = vadd.f32 %v12201_v4, %v539_v6 }
 0x10e   :  { %v613_v5 = vpop.f32.mrf.mxu1 }
 0x10f   :  { %v13576_v7 = vadd.f32 %v613_v5, %v533_v15  ;;  %v13590_v12 = vmul.f32 %v13584_v10, %v13578_v8  ;;  %v13634_v1 = vmul.f32 %v13578_v8, %v13267_v35 }
 0x111   :  { %v13582_v9 = vmul.f32 %v13574_v3, %v13576_v7  ;;  %v13612_v46 = vmul.f32 %v13576_v7, %v13247_v24 }
 0x112   :  { %v12212_v11 = vpop.f32.mrf.mxu0 }
 0x113   :  { %2279 = vrot.lane.b32.xlu1 %v13582_v9, %s13139_s19 }
 0x114   :  { %v698_v16 = vpop.f32.mrf.mxu0 }
 0x115   :  { %v12223_v14 = vpop.f32.mrf.mxu1 }
 0x116   :  { %v806_v18 = vadd.f32 %v12223_v14, %v12212_v11 }
 0x117   :  { %2281 = vrot.lane.b32.xlu1 %v13590_v12, %s13139_s19  ;;  %v799_v17 = vpop.f32.mrf.mxu1 }
 0x118   :  { %v800_v20 = vadd.f32 %v799_v17, %v698_v16 }
 0x11c   :  { %v12234_v22 = vpop.f32.mrf.mxu0 }
 0x11d   :  { %v893_v23 = vadd.f32 %v12234_v22, %v806_v18 }
 0x11e   :  { %v885_v25 = vpop.f32.mrf.mxu0 }
 0x11f   :  { %v12245_v27 = vpop.f32.mrf.mxu1  ;;  %v886_v29 = vadd.f32 %v885_v25, %v800_v20 }
 0x120   :  { %v978_v31 = vadd.f32 %v12245_v27, %v893_v23 }
 0x121   :  { %v969_v30 = vpop.f32.mrf.mxu1 }
 0x122   :  { %v970_v32 = vadd.f32 %v969_v30, %v886_v29 }
 0x125   :  { %v12256_v33 = vpop.f32.mrf.mxu0 }
 0x126   :  { %v1067_v34 = vadd.f32 %v12256_v33, %v978_v31  ;;  %v13140_v33 = vmov 0.0  }
 0x127   :  { %v1060_v38 = vpop.f32.mrf.mxu0  ;;  %12400 = vmatprep.subr.mxu0 %v13140_v33  ;;  %12405 = vmatprep.subr.mxu1 %v13140_v33 }
 0x128   :  { %v1061_v39 = vadd.f32 %v1060_v38, %v970_v32  ;;  %v12267_v40 = vpop.f32.mrf.mxu1  ;;  %12402 = vmatprep.mubr.msk.f32.mxu0 %vm13142_vm1, %v13140_v33  ;;  %12407 = vmatprep.mubr.msk.f32.mxu1 %vm13142_vm1, %v13140_v33 }
 0x129   :  { %v13594_v41 = vadd.f32 %v12267_v40, %v1067_v34 }
 0x12a   :  { %v1141_v42 = vpop.f32.mrf.mxu1 }
 0x12b   :  { %v13596_v43 = vadd.f32 %v1141_v42, %v1061_v39  ;;  %v13600_v44 = vmul.f32 %v13584_v10, %v13594_v41 }
 0x12d   :  { %2285 = vrot.lane.b32.xlu1 %v13600_v44, %s13139_s19  ;;  %v13606_v45 = vmul.f32 %v13574_v3, %v13596_v43 }
 0x12f   :  { %2283 = vrot.lane.b32.xlu0 %v13606_v45, %s13139_s19 }
 0x130   :  { %v12278_v47 = vpop.f32.mrf.mxu0 }
 0x131   :  { %2223 = vrot.lane.b32.xlu1 %v13612_v46, %s13139_s19 }
 0x132   :  { %v1226_v49 = vpop.f32.mrf.mxu0 }
 0x133   :  { %v12289_v48 = vpop.f32.mrf.mxu1 }
 0x134   :  { %v1334_v53 = vadd.f32 %v12289_v48, %v12278_v47 }
 0x135   :  { %v1327_v50 = vpop.f32.mrf.mxu1 }
 0x136   :  { %v1328_v51 = vadd.f32 %v1327_v50, %v1226_v49  ;;  %v13661_v49 = vmul.f32 %v13596_v43, %v13247_v24 }
 0x13a   :  { %v12300_v52 = vpop.f32.mrf.mxu0 }
 0x13b   :  { %v1421_v57 = vadd.f32 %v12300_v52, %v1334_v53 }
 0x13c   :  { %v1413_v54 = vpop.f32.mrf.mxu0 }
 0x13d   :  { %v12311_v55 = vpop.f32.mrf.mxu1  ;;  %v1414_v56 = vadd.f32 %v1413_v54, %v1328_v51 }
 0x13e   :  { %v1506_v26 = vadd.f32 %v12311_v55, %v1421_v57 }
 0x13f   :  { %v1497_v19 = vpop.f32.mrf.mxu1 }
 0x140   :  { %v1498_v21 = vadd.f32 %v1497_v19, %v1414_v56  ;;  %v13143_v19 = vmov 0  }
 0x141   :  { %13013 = vset.pattern.permute.xlu0 %v13143_v19  ;;  %13014 = vset.pattern.permute.xlu1 %v13143_v19 }
 0x143   :  { %v12322_v28 = vpop.f32.mrf.mxu0 }
 0x144   :  { %v1595_v59 = vadd.f32 %v12322_v28, %v1506_v26 }
 0x145   :  { %v1588_v36 = vpop.f32.mrf.mxu0 }
 0x146   :  { %v1589_v37 = vadd.f32 %v1588_v36, %v1498_v21  ;;  %v12333_v58 = vpop.f32.mrf.mxu1 }
 0x147   :  { %v13618_v62 = vadd.f32 %v12333_v58, %v1595_v59 }
 0x148   :  { %v1669_v60 = vpop.f32.mrf.mxu1 }
 0x149   :  { %v13616_v61 = vadd.f32 %v1669_v60, %v1589_v37  ;;  %v13628_v0 = vmul.f32 %v13584_v10, %v13618_v62 }
 0x14b   :  { %v13622_v63 = vmul.f32 %v13574_v3, %v13616_v61 }
 0x14d   :  { %2287 = vrot.lane.b32.xlu0 %v13622_v63, %s13139_s19 }
 0x14e   :  { %v12344_v2 = vpop.f32.mrf.mxu0 }
 0x150   :  { %v1754_v13 = vpop.f32.mrf.mxu0 }
 0x151   :  { %2289 = vrot.lane.b32.xlu0 %v13628_v0, %s13139_s19  ;;  %v12355_v4 = vpop.f32.mrf.mxu1 }
 0x152   :  { %v1862_v16 = vadd.f32 %v12355_v4, %v12344_v2 }
 0x153   :  { %v1855_v15 = vpop.f32.mrf.mxu1 }
 0x154   :  { %v1856_v6 = vadd.f32 %v1855_v15, %v1754_v13 }
 0x155   :  { %2225 = vrot.lane.b32.xlu0 %v13634_v1, %s13139_s19 }
 0x158   :  { %v12366_v5 = vpop.f32.mrf.mxu0 }
 0x159   :  { %v1949_v22 = vadd.f32 %v12366_v5, %v1862_v16 }
 0x15a   :  { %v1941_v11 = vpop.f32.mrf.mxu0 }
 0x15b   :  { %v12377_v14 = vpop.f32.mrf.mxu1  ;;  %v1942_v17 = vadd.f32 %v1941_v11, %v1856_v6 }
 0x15c   :  { %v2034_v29 = vadd.f32 %v12377_v14, %v1949_v22 }
 0x15d   :  { %v2025_v18 = vpop.f32.mrf.mxu1 }
 0x15e   :  { %v2026_v23 = vadd.f32 %v2025_v18, %v1942_v17 }
 0x161   :  { %v12388_v20 = vpop.f32.mrf.mxu0 }
 0x162   :  { %v2123_v34 = vadd.f32 %v12388_v20, %v2034_v29 }
 0x163   :  { %v2116_v25 = vpop.f32.mrf.mxu0 }
 0x164   :  { %v12399_v27 = vpop.f32.mrf.mxu1  ;;  %v2117_v30 = vadd.f32 %v2116_v25, %v2026_v23 }
 0x165   :  { %v13648_v42 = vadd.f32 %v12399_v27, %v2123_v34 }
 0x166   :  { %v2197_v31 = vpop.f32.mrf.mxu1 }
 0x167   :  { %v13640_v38 = vadd.f32 %v2197_v31, %v2117_v30  ;;  %v13694_v53 = vmul.f32 %v13648_v42, %v13267_v35 }
 0x169   :  { %v2269_v48 = vmul.f32 %v13574_v3, %v13640_v38  ;;  %v13669_v3 = vmul.f32 %v13594_v41, %v13267_v35  ;;  %v13687_v50 = vmul.f32 %v13640_v38, %v13247_v24 }
 0x185   :  { %v2280_v32 = vpop.permute.xlu1 %2279 }
 0x186   :  { %v2303_v39 = vadd.f32 %v2280_v32, %v13582_v9  ;;  %v13657_v9 = vmul.f32 %v13584_v10, %v13648_v42  ;;  %v13675_v10 = vmul.f32 %v13616_v61, %v13247_v24 }
 0x188   :  { %2312 = vrot.lane.b32.xlu1 %v2303_v39, %s13141_s20 }
 0x189   :  { %v2282_v40 = vpop.permute.xlu1 %2281 }
 0x18a   :  { %v2304_v47 = vadd.f32 %v2282_v40, %v13590_v12  ;;  %v13681_v12 = vmul.f32 %v13618_v62, %v13267_v35  ;;  %v5944_v35 = vld [vmem:[%s14413_s1] sm:$0xff] }
 0x18c   :  { %2767 = vrot.lane.b32.xlu0 %v2304_v47, %s13141_s20  ;;  %2291 = vrot.lane.b32.xlu1 %v2269_v48, %s13139_s19 }
 0x190   :  { %2293 = vrot.lane.b32.xlu0 %v13657_v9, %s13139_s19  ;;  %2227 = vrot.lane.b32.xlu1 %v13661_v49, %s13139_s19 }
 0x194   :  { %2229 = vrot.lane.b32.xlu0 %v13669_v3, %s13139_s19 }
 0x198   :  { %2231 = vrot.lane.b32.xlu0 %v13675_v10, %s13139_s19 }
 0x19c   :  { %2233 = vrot.lane.b32.xlu0 %v13681_v12, %s13139_s19 }
 0x19f   :  { %v2286_v54 = vpop.permute.xlu1 %2285 }
 0x1a0   :  { %2235 = vrot.lane.b32.xlu0 %v13687_v50, %s13139_s19  ;;  %v2306_v55 = vadd.f32 %v2286_v54, %v13600_v44  ;;  %v5945_v54 = vld [vmem:[%s14413_s1 + $0x8] sm:$0xff] }
 0x1a1   :  { %v2284_v51 = vpop.permute.xlu0 %2283 }
 0x1a2   :  { %v2305_v52 = vadd.f32 %v2284_v51, %v13606_v45 }
 0x1a3   :  { %v2224_v44 = vpop.permute.xlu1 %2223 }
 0x1a4   :  { %3221 = vrot.lane.b32.xlu1 %v2305_v52, %s13141_s20  ;;  %2237 = vrot.lane.b32.xlu0 %v13694_v53, %s13139_s19  ;;  %v2247_v21 = vadd.f32 %v2224_v44, %v13612_v46 }
 0x1a6   :  { %v2316_v26 = vsel %vm2314_vm2, %v2247_v21, 0 }
 0x1a7   :  { %v13710_v28 = vand.u32 4294901760, %v2316_v26 }
 0x1a8   :  { %3675 = vrot.lane.b32.xlu1 %v2306_v55, %s13141_s20  ;;  %5950 = vperm.xlu0 %13013, %v5944_v35  }
 0x1a9   :  { %v2387_v37 = vsub.f32 %v2316_v26, %v13710_v28 }
 0x1ab   :  { %v2388_v59 = vand.u32 4294901760, %v2387_v37 }
 0x1ad   :  { %v2389_v13 = vsub.f32 %v2387_v37, %v2388_v59 }
 0x1af   :  { %v2390_v14 = vand.u32 4294901760, %v2389_v13 }
 0x1bf   :  { %v2288_v24 = vpop.permute.xlu0 %2287 }
 0x1c0   :  { %v2307_v56 = vadd.f32 %v2288_v24, %v13622_v63 }
 0x1c2   :  { %4129 = vrot.lane.b32.xlu1 %v2307_v56, %s13141_s20 }
 0x1c3   :  { %v2290_v45 = vpop.permute.xlu0 %2289 }
 0x1c4   :  { %v2308_v57 = vadd.f32 %v2290_v45, %v13628_v0 }
 0x1c6   :  { %4583 = vrot.lane.b32.xlu1 %v2308_v57, %s13141_s20 }
 0x1c7   :  { %v2226_v36 = vpop.permute.xlu0 %2225 }
 0x1c8   :  { %v2248_v58 = vadd.f32 %v2226_v36, %v13634_v1 }
 0x1ca   :  { %v2770_v60 = vsel %vm2314_vm2, %v2248_v58, 0 }
 0x1cb   :  { %v13715_v0 = vand.u32 4294901760, %v2770_v60 }
 0x1cd   :  { %v13719_v6 = vsub.f32 %v2770_v60, %v13715_v0 }
 0x1cf   :  { %v2842_v23 = vand.u32 4294901760, %v13719_v6 }
 0x1d1   :  { %v2843_v31 = vsub.f32 %v13719_v6, %v2842_v23 }
 0x1d3   :  { %v2844_v40 = vand.u32 4294901760, %v2843_v31 }
 0x1fa   :  { %v2313_v63 = vpop.permute.xlu1 %2312 }
 0x1fb   :  { %v2318_v2 = vsel %vm2314_vm2, %v2313_v63, 0 }
 0x1fc   :  { %v2351_v46 = vand.u32 4294901760, %v2318_v2 }
 0x1fe   :  { %v2428_v4 = vsub.f32 %v2318_v2, %v2351_v46  ;;  %v2768_v15 = vpop.permute.xlu0 %2767  ;;  %12401 = vmatpush3.xpose.msra.mxu0 %v2351_v46  ;;  %v2292_v5 = vpop.permute.xlu1 %2291 }
 0x1ff   :  { %v2772_v11 = vsel %vm2314_vm2, %v2768_v15, 0  ;;  %v2309_v1 = vadd.f32 %v2292_v5, %v2269_v48  ;;  %12410 = vmatprep.subr.mxu0 %v13140_v33 }
 0x200   :  { %v2429_v16 = vand.u32 4294901760, %v2428_v4  ;;  %v13723_v17 = vand.u32 4294901760, %v2772_v11 }
 0x201   :  { %12403 = vmatmul.mubr.f32.vlgmr.msra.gmra.mxu0 %v2390_v14  ;;  %5037 = vrot.lane.b32.xlu1 %v2309_v1, %s13141_s20 }
 0x202   :  { %v2430_v18 = vsub.f32 %v2428_v4, %v2429_v16  ;;  %v2294_v20 = vpop.permute.xlu0 %2293  ;;  %12411 = vmatpush3.xpose.msra.mxu0 %v2428_v4  ;;  %v2228_v22 = vpop.permute.xlu1 %2227  ;;  %12412 = vmatprep.mubr.msk.f32.mxu0 %vm13142_vm1, %v13140_v33  ;;  %v2882_v29 = vsub.f32 %v2772_v11, %v13723_v17 }
 0x203   :  { %v2310_v25 = vadd.f32 %v2294_v20, %v13657_v9  ;;  %12420 = vmatprep.subr.mxu0 %v13140_v33  ;;  %v2249_v30 = vadd.f32 %v2228_v22, %v13661_v49 }
 0x204   :  { %v2431_v27 = vand.u32 4294901760, %v2430_v18  ;;  %v2883_v32 = vand.u32 4294901760, %v2882_v29 }
 0x205   :  { %12413 = vmatmul.mubr.f32.vlgmr.msra.gmra.mxu0 %v2387_v37  ;;  %5491 = vrot.lane.b32.xlu1 %v2310_v25, %s13141_s20  ;;  %v3224_v34 = vsel %vm2314_vm2, %v2249_v30, 0 }
 0x206   :  { %12406 = vmatpush3.xpose.msra.mxu1 %v2431_v27  ;;  %12421 = vmatpush3.xpose.msra.mxu0 %v2429_v16  ;;  %v13743_v39 = vand.u32 4294901760, %v3224_v34  ;;  %v2884_v47 = vsub.f32 %v2882_v29, %v2883_v32  ;;  %v2230_v48 = vpop.permute.xlu0 %2229 }
 0x207   :  { %12422 = vmatprep.mubr.msk.f32.mxu0 %vm13142_vm1, %v13140_v33  ;;  %12415 = vmatprep.subr.mxu1 %v13140_v33  ;;  %v2250_v51 = vadd.f32 %v2230_v48, %v13669_v3 }
 0x208   :  { %12430 = vmatprep.subr.mxu0 %v13140_v33  ;;  %v13752_v9 = vsub.f32 %v3224_v34, %v13743_v39  ;;  %v2885_v49 = vand.u32 4294901760, %v2884_v47 }
 0x209   :  { %12408 = vmatmul.mubr.f32.vlgmr.msra.gmra.mxu1 %v13710_v28  ;;  %12423 = vmatmul.mubr.f32.vlgmr.msra.gmra.mxu0 %v13710_v28  ;;  %v3678_v3 = vsel %vm2314_vm2, %v2250_v51, 0 }
 0x20a   :  { %12416 = vmatpush3.xpose.msra.mxu1 %v2351_v46  ;;  %12431 = vmatpush3.xpose.msra.mxu0 %v13723_v17  ;;  %v3296_v52 = vand.u32 4294901760, %v13752_v9  ;;  %v13779_v24 = vand.u32 4294901760, %v3678_v3 }
 0x20b   :  { %12417 = vmatprep.mubr.msk.f32.mxu1 %vm13142_vm1, %v13140_v33  ;;  %12432 = vmatprep.mubr.msk.f32.mxu0 %vm13142_vm1, %v13140_v33 }
 0x20c   :  { %12425 = vmatprep.subr.mxu1 %v13140_v33  ;;  %12440 = vmatprep.subr.mxu0 %v13140_v33  ;;  %v3297_v45 = vsub.f32 %v13752_v9, %v3296_v52  ;;  %v13790_v44 = vsub.f32 %v3678_v3, %v13779_v24 }
 0x20d   :  { %12418 = vmatmul.mubr.f32.vlgmr.msra.gmra.mxu1 %v2388_v59  ;;  %12433 = vmatmul.mubr.f32.vlgmr.msra.gmra.mxu0 %v2844_v40  ;;  %v2232_v59 = vpop.permute.xlu0 %2231 }
 0x20e   :  { %12426 = vmatpush3.xpose.msra.mxu1 %v2351_v46  ;;  %12441 = vmatpush3.xpose.msra.mxu0 %v2882_v29  ;;  %v3298_v26 = vand.u32 4294901760, %v3297_v45  ;;  %v3750_v58 = vand.u32 4294901760, %v13790_v44 }
 0x20f   :  { %12427 = vmatprep.mubr.msk.f32.mxu1 %vm13142_vm1, %v13140_v33  ;;  %12442 = vmatprep.mubr.msk.f32.mxu0 %vm13142_vm1, %v13140_v33 }
 0x210   :  { %12435 = vmatprep.subr.mxu1 %v13140_v33  ;;  %12450 = vmatprep.subr.mxu0 %v13140_v33  ;;  %v3751_v2 = vsub.f32 %v13790_v44, %v3750_v58 }
 0x211   :  { %12428 = vmatmul.mubr.f32.vlgmr.msra.gmra.mxu1 %v13710_v28  ;;  %12443 = vmatmul.mubr.f32.vlgmr.msra.gmra.mxu0 %v13719_v6  ;;  %v2234_v5 = vpop.permute.xlu0 %2233 }
 0x212   :  { %12436 = vmatpush3.xpose.msra.mxu1 %v2885_v49  ;;  %12451 = vmatpush3.xpose.msra.mxu0 %v2883_v32  ;;  %v2252_v1 = vadd.f32 %v2234_v5, %v13681_v12 }
 0x213   :  { %12437 = vmatprep.mubr.msk.f32.mxu1 %vm13142_vm1, %v13140_v33  ;;  %12452 = vmatprep.mubr.msk.f32.mxu0 %vm13142_vm1, %v13140_v33 }
 0x214   :  { %12445 = vmatprep.subr.mxu1 %v13140_v33  ;;  %12460 = vmatprep.subr.mxu0 %v13140_v33  ;;  %v4586_v12 = vsel %vm2314_vm2, %v2252_v1, 0 }
 0x215   :  { %12438 = vmatmul.mubr.f32.vlgmr.msra.gmra.mxu1 %v13715_v0  ;;  %12453 = vmatmul.mubr.f32.vlgmr.msra.gmra.mxu0 %v13715_v0  ;;  %v2236_v3 = vpop.permute.xlu0 %2235 }
 0x216   :  { %v3222_v55 = vpop.permute.xlu1 %3221  ;;  %12446 = vmatpush3.xpose.msra.mxu1 %v13723_v17  ;;  %12447 = vmatprep.mubr.msk.f32.mxu1 %vm13142_vm1, %v13140_v33 }
 0x217   :  { %v3226_v56 = vsel %vm2314_vm2, %v3222_v55, 0  ;;  %12462 = vmatprep.mubr.msk.f32.mxu0 %vm13142_vm1, %v13140_v33  ;;  %12455 = vmatprep.subr.mxu1 %v13140_v33 }
 0x218   :  { %v3259_v57 = vand.u32 4294901760, %v3226_v56  ;;  %5955 = vperm.xlu1 %13014, %v5945_v54   ;;  %v2253_v54 = vadd.f32 %v2236_v3, %v13687_v50 }
 0x219   :  { %12448 = vmatmul.mubr.f32.vlgmr.msra.gmra.mxu1 %v2842_v23 }
 0x21a   :  { %v3336_v35 = vsub.f32 %v3226_v56, %v3259_v57  ;;  %12461 = vmatpush3.xpose.msra.mxu0 %v3259_v57  ;;  %v3676_v19 = vpop.permute.xlu1 %3675  ;;  %12456 = vmatpush3.xpose.msra.mxu1 %v13723_v17  ;;  %v13856_v17 = vand.u32 4294901760, %v4586_v12  ;;  %v5040_v55 = vsel %vm2314_vm2, %v2253_v54, 0  ;;  %v2238_v56 = vpop.permute.xlu0 %2237 }
 0x21b   :  { %v3680_v21 = vsel %vm2314_vm2, %v3676_v19, 0  ;;  %12470 = vmatprep.subr.mxu0 %v13140_v33  ;;  %12457 = vmatprep.mubr.msk.f32.mxu1 %vm13142_vm1, %v13140_v33 }
 0x21c   :  { %v3337_v28 = vand.u32 4294901760, %v3336_v35  ;;  %v13796_v36 = vand.u32 4294901760, %v3680_v21  ;;  %12465 = vmatprep.subr.mxu1 %v13140_v33  ;;  %v4657_v27 = vsub.f32 %v4586_v12, %v13856_v17  ;;  %v11723_v12 = vld [vmem:[%s14414_s2] ss:$0 sm:$0xff] }
 0x21d   :  { %12463 = vmatmul.mubr.f32.vlgmr.msra.gmra.mxu0 %v3298_v26  ;;  %12458 = vmatmul.mubr.f32.vlgmr.msra.gmra.mxu1 %v13715_v0  ;;  %v2251_v0 = vadd.f32 %v2232_v59, %v13675_v10  ;;  %v3752_v10 = vand.u32 4294901760, %v3751_v2 }
 0x21e   :  { %v3338_v37 = vsub.f32 %v3336_v35, %v3337_v28  ;;  %12471 = vmatpush3.xpose.msra.mxu0 %v3336_v35  ;;  %12472 = vmatprep.mubr.msk.f32.mxu0 %vm13142_vm1, %v13140_v33  ;;  %v3790_v63 = vsub.f32 %v3680_v21, %v13796_v36 }
 0x21f   :  { %12480 = vmatprep.subr.mxu0 %v13140_v33  ;;  %12467 = vmatprep.mubr.msk.f32.mxu1 %vm13142_vm1, %v13140_v33  ;;  %v4132_v46 = vsel %vm2314_vm2, %v2251_v0, 0 }
 0x220   :  { %v3339_v60 = vand.u32 4294901760, %v3338_v37  ;;  %v3791_v13 = vand.u32 4294901760, %v3790_v63  ;;  %v13824_v15 = vand.u32 4294901760, %v4132_v46 }
 0x221   :  { %12473 = vmatmul.mubr.f32.vlgmr.msra.gmra.mxu0 %v13752_v9 }
 0x222   :  { %12466 = vmatpush3.xpose.msra.mxu1 %v3339_v60  ;;  %12481 = vmatpush3.xpose.msra.mxu0 %v3337_v28  ;;  %v3792_v4 = vsub.f32 %v3790_v63, %v3791_v13  ;;  %v13835_v11 = vsub.f32 %v4132_v46, %v13824_v15 }
 0x223   :  { %12482 = vmatprep.mubr.msk.f32.mxu0 %vm13142_vm1, %v13140_v33  ;;  %12475 = vmatprep.subr.mxu1 %v13140_v33 }
 0x224   :  { %12490 = vmatprep.subr.mxu0 %v13140_v33  ;;  %v3793_v6 = vand.u32 4294901760, %v3792_v4  ;;  %v4204_v14 = vand.u32 4294901760, %v13835_v11 }
 0x225   :  { %12468 = vmatmul.mubr.f32.vlgmr.msra.gmra.mxu1 %v13743_v39  ;;  %12483 = vmatmul.mubr.f32.vlgmr.msra.gmra.mxu0 %v13743_v39 }
 0x226   :  { %12476 = vmatpush3.xpose.msra.mxu1 %v3259_v57  ;;  %12491 = vmatpush3.xpose.msra.mxu0 %v13796_v36  ;;  %v4205_v20 = vsub.f32 %v13835_v11, %v4204_v14 }
 0x227   :  { %12477 = vmatprep.mubr.msk.f32.mxu1 %vm13142_vm1, %v13140_v33  ;;  %12492 = vmatprep.mubr.msk.f32.mxu0 %vm13142_vm1, %v13140_v33 }
 0x228   :  { %12485 = vmatprep.subr.mxu1 %v13140_v33  ;;  %12500 = vmatprep.subr.mxu0 %v13140_v33  ;;  %v4206_v30 = vand.u32 4294901760, %v4205_v20 }
 0x229   :  { %12478 = vmatmul.mubr.f32.vlgmr.msra.gmra.mxu1 %v3296_v52  ;;  %12493 = vmatmul.mubr.f32.vlgmr.msra.gmra.mxu0 %v3752_v10 }
 0x22a   :  { %12486 = vmatpush3.xpose.msra.mxu1 %v3259_v57  ;;  %12501 = vmatpush3.xpose.msra.mxu0 %v3790_v63  ;;  %v2254_v57 = vadd.f32 %v2238_v56, %v13694_v53 }
 0x22b   :  { %12487 = vmatprep.mubr.msk.f32.mxu1 %vm13142_vm1, %v13140_v33  ;;  %12502 = vmatprep.mubr.msk.f32.mxu0 %vm13142_vm1, %v13140_v33 }
 0x22c   :  { %12495 = vmatprep.subr.mxu1 %v13140_v33  ;;  %12510 = vmatprep.subr.mxu0 %v13140_v33  ;;  %v5494_v19 = vsel %vm2314_vm2, %v2254_v57, 0 }
 0x22d   :  { %12488 = vmatmul.mubr.f32.vlgmr.msra.gmra.mxu1 %v13743_v39  ;;  %12503 = vmatmul.mubr.f32.vlgmr.msra.gmra.mxu0 %v13790_v44  ;;  %v4658_v39 = vand.u32 4294901760, %v4657_v27  ;;  %v13916_v21 = vand.u32 4294901760, %v5494_v19 }
 0x22e   :  { %12496 = vmatpush3.xpose.msra.mxu1 %v3793_v6  ;;  %12511 = vmatpush3.xpose.msra.mxu0 %v3791_v13 }
 0x22f   :  { %12497 = vmatprep.mubr.msk.f32.mxu1 %vm13142_vm1, %v13140_v33  ;;  %12512 = vmatprep.mubr.msk.f32.mxu0 %vm13142_vm1, %v13140_v33  ;;  %v4659_v48 = vsub.f32 %v4657_v27, %v4658_v39 }
 0x230   :  { %12505 = vmatprep.subr.mxu1 %v13140_v33  ;;  %12520 = vmatprep.subr.mxu0 %v13140_v33 }
 0x231   :  { %12498 = vmatmul.mubr.f32.vlgmr.msra.gmra.mxu1 %v13779_v24  ;;  %12513 = vmatmul.mubr.f32.vlgmr.msra.gmra.mxu0 %v13779_v24  ;;  %v4660_v49 = vand.u32 4294901760, %v4659_v48 }
 0x232   :  { %12506 = vmatpush3.xpose.msra.mxu1 %v13796_v36  ;;  %12507 = vmatprep.mubr.msk.f32.mxu1 %vm13142_vm1, %v13140_v33 }
 0x233   :  { %12522 = vmatprep.mubr.msk.f32.mxu0 %vm13142_vm1, %v13140_v33  ;;  %12515 = vmatprep.subr.mxu1 %v13140_v33 }
 0x234   :  { %v4130_v16 = vpop.permute.xlu1 %4129 }
 0x235   :  { %v4134_v18 = vsel %vm2314_vm2, %v4130_v16, 0  ;;  %12508 = vmatmul.mubr.f32.vlgmr.msra.gmra.mxu1 %v3750_v58  ;;  %v5565_v58 = vsub.f32 %v5494_v19, %v13916_v21  ;;  %v5951_v16 = vpop.permute.xlu0 %5950 }
 0x236   :  { %v4167_v22 = vand.u32 4294901760, %v4134_v18  ;;  %12516 = vmatpush3.xpose.msra.mxu1 %v13796_v36  ;;  %12517 = vmatprep.mubr.msk.f32.mxu1 %vm13142_vm1, %v13140_v33 }
 0x237   :  { %12525 = vmatprep.subr.mxu1 %v13140_v33  ;;  %v5566_v2 = vand.u32 4294901760, %v5565_v58 }
 0x238   :  { %v4244_v23 = vsub.f32 %v4134_v18, %v4167_v22  ;;  %12521 = vmatpush3.xpose.msra.mxu0 %v4167_v22  ;;  %v4584_v25 = vpop.permute.xlu1 %4583  ;;  %v5970_v18 = vmul.f32 %v11723_v12, %v5951_v16 }
 0x239   :  { %v4588_v29 = vsel %vm2314_vm2, %v4584_v25, 0  ;;  %12530 = vmatprep.subr.mxu0 %v13140_v33  ;;  %12518 = vmatmul.mubr.f32.vlgmr.msra.gmra.mxu1 %v13779_v24  ;;  %v5110_v24 = vand.u32 4294901760, %v5040_v55  ;;  %v5567_v10 = vsub.f32 %v5565_v58, %v5566_v2 }
 0x23a   :  { %v4245_v31 = vand.u32 4294901760, %v4244_v23  ;;  %v4621_v32 = vand.u32 4294901760, %v4588_v29  ;;  %12527 = vmatprep.mubr.msk.f32.mxu1 %vm13142_vm1, %v13140_v33 }
 0x23b   :  { %12523 = vmatmul.mubr.f32.vlgmr.msra.gmra.mxu0 %v4206_v30  ;;  %v5111_v45 = vsub.f32 %v5040_v55, %v5110_v24 }
 0x23c   :  { %v4246_v34 = vsub.f32 %v4244_v23, %v4245_v31  ;;  %12531 = vmatpush3.xpose.msra.mxu0 %v4244_v23  ;;  %12532 = vmatprep.mubr.msk.f32.mxu0 %vm13142_vm1, %v13140_v33  ;;  %v4698_v47 = vsub.f32 %v4588_v29, %v4621_v32  ;;  %v11725_v29 = vadd.f32 -1.0, %v5970_v18 }
 0x23d   :  { %12540 = vmatprep.subr.mxu0 %v13140_v33  ;;  %v5112_v35 = vand.u32 4294901760, %v5111_v45 }
 0x23e   :  { %v4247_v40 = vand.u32 4294901760, %v4246_v34  ;;  %v4699_v9 = vand.u32 4294901760, %v4698_v47 }
 0x23f   :  { %12533 = vmatmul.mubr.f32.vlgmr.msra.gmra.mxu0 %v13835_v11  ;;  %v5113_v28 = vsub.f32 %v5111_v45, %v5112_v35 }
 0x240   :  { %12526 = vmatpush3.xpose.msra.mxu1 %v4247_v40  ;;  %12541 = vmatpush3.xpose.msra.mxu0 %v4245_v31  ;;  %v4700_v51 = vsub.f32 %v4698_v47, %v4699_v9 }
 0x241   :  { %12542 = vmatprep.mubr.msk.f32.mxu0 %vm13142_vm1, %v13140_v33  ;;  %12535 = vmatprep.subr.mxu1 %v13140_v33  ;;  %v5114_v60 = vand.u32 4294901760, %v5113_v28 }
 0x242   :  { %12550 = vmatprep.subr.mxu0 %v13140_v33  ;;  %v4701_v52 = vand.u32 4294901760, %v4700_v51 }
 0x243   :  { %12528 = vmatmul.mubr.f32.vlgmr.msra.gmra.mxu1 %v13824_v15  ;;  %12543 = vmatmul.mubr.f32.vlgmr.msra.gmra.mxu0 %v13824_v15 }
 0x244   :  { %12536 = vmatpush3.xpose.msra.mxu1 %v4167_v22  ;;  %12551 = vmatpush3.xpose.msra.mxu0 %v4621_v32 }
 0x245   :  { %12537 = vmatprep.mubr.msk.f32.mxu1 %vm13142_vm1, %v13140_v33  ;;  %12552 = vmatprep.mubr.msk.f32.mxu0 %vm13142_vm1, %v13140_v33 }
 0x246   :  { %12545 = vmatprep.subr.mxu1 %v13140_v33  ;;  %12560 = vmatprep.subr.mxu0 %v13140_v33 }
 0x247   :  { %12538 = vmatmul.mubr.f32.vlgmr.msra.gmra.mxu1 %v4204_v14  ;;  %12553 = vmatmul.mubr.f32.vlgmr.msra.gmra.mxu0 %v4660_v49 }
 0x248   :  { %12546 = vmatpush3.xpose.msra.mxu1 %v4167_v22  ;;  %12561 = vmatpush3.xpose.msra.mxu0 %v4698_v47  ;;  %v13963_v47 = vmul.f32 100000.0, %v11725_v29 }
 0x249   :  { %12547 = vmatprep.mubr.msk.f32.mxu1 %vm13142_vm1, %v13140_v33  ;;  %12562 = vmatprep.mubr.msk.f32.mxu0 %vm13142_vm1, %v13140_v33 }
 0x24a   :  { %12555 = vmatprep.subr.mxu1 %v13140_v33  ;;  %12570 = vmatprep.subr.mxu0 %v13140_v33 }
 0x24b   :  { %12548 = vmatmul.mubr.f32.vlgmr.msra.gmra.mxu1 %v13824_v15  ;;  %12563 = vmatmul.mubr.f32.vlgmr.msra.gmra.mxu0 %v4657_v27  ;;  %v5568_v15 = vand.u32 4294901760, %v5567_v10 }
 0x24c   :  { %12556 = vmatpush3.xpose.msra.mxu1 %v4701_v52  ;;  %12571 = vmatpush3.xpose.msra.mxu0 %v4699_v9  ;;  %v11724_v52 = vld [vmem:[%s14414_s2 + $0x1] ss:$0 sm:$0xff]  ;;  %s13144_s2 = smov 96  }
 0x24d   :  { %12557 = vmatprep.mubr.msk.f32.mxu1 %vm13142_vm1, %v13140_v33  ;;  %12572 = vmatprep.mubr.msk.f32.mxu0 %vm13142_vm1, %v13140_v33 }
 0x24e   :  { %12565 = vmatprep.subr.mxu1 %v13140_v33  ;;  %12580 = vmatprep.subr.mxu0 %v13140_v33 }
 0x24f   :  { %12558 = vmatmul.mubr.f32.vlgmr.msra.gmra.mxu1 %v13856_v17  ;;  %12573 = vmatmul.mubr.f32.vlgmr.msra.gmra.mxu0 %v13856_v17 }
 0x250   :  { %12566 = vmatpush3.xpose.msra.mxu1 %v4621_v32  ;;  %12567 = vmatprep.mubr.msk.f32.mxu1 %vm13142_vm1, %v13140_v33 }
 0x251   :  { %12575 = vmatprep.subr.mxu1 %v13140_v33  ;;  %12582 = vmatprep.mubr.msk.f32.mxu0 %vm13142_vm1, %v13140_v33 }
 0x253   :  { %12568 = vmatmul.mubr.f32.vlgmr.msra.gmra.mxu1 %v4658_v39 }
 0x254   :  { %12576 = vmatpush3.xpose.msra.mxu1 %v4621_v32  ;;  %12577 = vmatprep.mubr.msk.f32.mxu1 %vm13142_vm1, %v13140_v33 }
 0x255   :  { %12585 = vmatprep.subr.mxu1 %v13140_v33 }
 0x257   :  { %12578 = vmatmul.mubr.f32.vlgmr.msra.gmra.mxu1 %v13856_v17 }
 0x258   :  { %12587 = vmatprep.mubr.msk.f32.mxu1 %vm13142_vm1, %v13140_v33 }
 0x273   :  { %v5038_v44 = vpop.permute.xlu1 %5037 }
 0x274   :  { %v5042_v26 = vsel %vm2314_vm2, %v5038_v44, 0 }
 0x275   :  { %v5075_v36 = vand.u32 4294901760, %v5042_v26 }
 0x277   :  { %v5152_v37 = vsub.f32 %v5042_v26, %v5075_v36  ;;  %12581 = vmatpush3.xpose.msra.mxu0 %v5075_v36  ;;  %v5492_v50 = vpop.permute.xlu1 %5491 }
 0x278   :  { %v5496_v59 = vsel %vm2314_vm2, %v5492_v50, 0  ;;  %12590 = vmatprep.subr.mxu0 %v13140_v33 }
 0x279   :  { %v5153_v53 = vand.u32 4294901760, %v5152_v37  ;;  %v5529_v63 = vand.u32 4294901760, %v5496_v59 }
 0x27a   :  { %12583 = vmatmul.mubr.f32.vlgmr.msra.gmra.mxu0 %v5114_v60 }
 0x27b   :  { %v5154_v0 = vsub.f32 %v5152_v37, %v5153_v53  ;;  %12591 = vmatpush3.xpose.msra.mxu0 %v5152_v37  ;;  %12592 = vmatprep.mubr.msk.f32.mxu0 %vm13142_vm1, %v13140_v33  ;;  %v5606_v46 = vsub.f32 %v5496_v59, %v5529_v63 }
 0x27c   :  { %12600 = vmatprep.subr.mxu0 %v13140_v33 }
 0x27d   :  { %v5155_v13 = vand.u32 4294901760, %v5154_v0  ;;  %v5607_v4 = vand.u32 4294901760, %v5606_v46 }
 0x27e   :  { %12593 = vmatmul.mubr.f32.vlgmr.msra.gmra.mxu0 %v5111_v45 }
 0x27f   :  { %12586 = vmatpush3.xpose.msra.mxu1 %v5155_v13  ;;  %12601 = vmatpush3.xpose.msra.mxu0 %v5153_v53  ;;  %v5608_v5 = vsub.f32 %v5606_v46, %v5607_v4 }
 0x280   :  { %12602 = vmatprep.mubr.msk.f32.mxu0 %vm13142_vm1, %v13140_v33  ;;  %12595 = vmatprep.subr.mxu1 %v13140_v33 }
 0x281   :  { %12610 = vmatprep.subr.mxu0 %v13140_v33  ;;  %v5609_v6 = vand.u32 4294901760, %v5608_v5 }
 0x282   :  { %12588 = vmatmul.mubr.f32.vlgmr.msra.gmra.mxu1 %v5110_v24  ;;  %12603 = vmatmul.mubr.f32.vlgmr.msra.gmra.mxu0 %v5110_v24 }
 0x283   :  { %12596 = vmatpush3.xpose.msra.mxu1 %v5075_v36  ;;  %12611 = vmatpush3.xpose.msra.mxu0 %v5529_v63 }
 0x284   :  { %12597 = vmatprep.mubr.msk.f32.mxu1 %vm13142_vm1, %v13140_v33  ;;  %12612 = vmatprep.mubr.msk.f32.mxu0 %vm13142_vm1, %v13140_v33 }
 0x285   :  { %12605 = vmatprep.subr.mxu1 %v13140_v33  ;;  %12620 = vmatprep.subr.mxu0 %v13140_v33 }
 0x286   :  { %12598 = vmatmul.mubr.f32.vlgmr.msra.gmra.mxu1 %v5112_v35  ;;  %12613 = vmatmul.mubr.f32.vlgmr.msra.gmra.mxu0 %v5568_v15 }
 0x287   :  { %12606 = vmatpush3.xpose.msra.mxu1 %v5075_v36  ;;  %12621 = vmatpush3.xpose.msra.mxu0 %v5606_v46 }
 0x288   :  { %12607 = vmatprep.mubr.msk.f32.mxu1 %vm13142_vm1, %v13140_v33  ;;  %12622 = vmatprep.mubr.msk.f32.mxu0 %vm13142_vm1, %v13140_v33 }
 0x289   :  { %12615 = vmatprep.subr.mxu1 %v13140_v33  ;;  %12630 = vmatprep.subr.mxu0 %v13140_v33 }
 0x28a   :  { %12608 = vmatmul.mubr.f32.vlgmr.msra.gmra.mxu1 %v5110_v24  ;;  %12623 = vmatmul.mubr.f32.vlgmr.msra.gmra.mxu0 %v5565_v58 }
 0x28b   :  { %12616 = vmatpush3.xpose.msra.mxu1 %v5609_v6  ;;  %12631 = vmatpush3.xpose.msra.mxu0 %v5607_v4 }
 0x28c   :  { %12617 = vmatprep.mubr.msk.f32.mxu1 %vm13142_vm1, %v13140_v33  ;;  %12632 = vmatprep.mubr.msk.f32.mxu0 %vm13142_vm1, %v13140_v33 }
 0x28d   :  { %12625 = vmatprep.subr.mxu1 %v13140_v33  ;;  %12640 = vmatprep.subr.mxu0 %v13140_v33 }
 0x28e   :  { %12618 = vmatmul.mubr.f32.vlgmr.msra.gmra.mxu1 %v13916_v21  ;;  %12633 = vmatmul.mubr.f32.vlgmr.msra.gmra.mxu0 %v13916_v21 }
 0x28f   :  { %12626 = vmatpush3.xpose.msra.mxu1 %v5529_v63  ;;  %12627 = vmatprep.mubr.msk.f32.mxu1 %vm13142_vm1, %v13140_v33 }
 0x290   :  { %12635 = vmatprep.subr.mxu1 %v13140_v33  ;;  %12642 = vmatprep.mubr.msk.f32.mxu0 %vm13142_vm1, %v13140_v33 }
 0x292   :  { %12628 = vmatmul.mubr.f32.vlgmr.msra.gmra.mxu1 %v5566_v2 }
 0x293   :  { %12636 = vmatpush3.xpose.msra.mxu1 %v5529_v63  ;;  %12637 = vmatprep.mubr.msk.f32.mxu1 %vm13142_vm1, %v13140_v33  ;;  %v5956_v9 = vpop.permute.xlu1 %5955 }
 0x294   :  { %12645 = vmatprep.subr.mxu1 %v13140_v33  ;;  %v5971_v56 = vmul.f32 %v11724_v52, %v5956_v9 }
 0x296   :  { %12638 = vmatmul.mubr.f32.vlgmr.msra.gmra.mxu1 %v13916_v21  ;;  %v11726_v28 = vadd.f32 -1.0, %v5971_v56 }
 0x297   :  { %12647 = vmatprep.mubr.msk.f32.mxu1 %vm13142_vm1, %v13140_v33 }
 0x298   :  { %v13973_v58 = vmul.f32 100000.0, %v11726_v28 }
 0x2c1   :  { %v2392_v11 = vpop.f32.mrf.mxu0 }
 0x2c3   :  { %v12404_v1 = vpop.f32.mrf.mxu0 }
 0x2c5   :  { %v2542_v14 = vpop.f32.mrf.mxu0 }
 0x2c7   :  { %v12414_v17 = vpop.f32.mrf.mxu0 }
 0x2c9   :  { %v2468_v20 = vpop.f32.mrf.mxu1  ;;  %v2690_v22 = vpop.f32.mrf.mxu0 }
 0x2ca   :  { %v2469_v23 = vadd.f32 %v2468_v20, %v2392_v11 }
 0x2cb   :  { %v12409_v25 = vpop.f32.mrf.mxu1  ;;  %v12424_v27 = vpop.f32.mrf.mxu0 }
 0x2cc   :  { %v2543_v30 = vadd.f32 %v2542_v14, %v2469_v23 }
 0x2cd   :  { %v2616_v31 = vpop.f32.mrf.mxu1  ;;  %v2846_v32 = vpop.f32.mrf.mxu0 }
 0x2ce   :  { %v2617_v34 = vadd.f32 %v2616_v31, %v2543_v30 }
 0x2cf   :  { %v12419_v39 = vpop.f32.mrf.mxu1  ;;  %v12434_v40 = vpop.f32.mrf.mxu0 }
 0x2d0   :  { %v2691_v48 = vadd.f32 %v2690_v22, %v2617_v34 }
 0x2d1   :  { %v2762_v49 = vpop.f32.mrf.mxu1  ;;  %v2996_v51 = vpop.f32.mrf.mxu0 }
 0x2d2   :  { %v2763_v3 = vadd.f32 %v2762_v49, %v2691_v48 }
 0x2d3   :  { %v12429_v54 = vpop.f32.mrf.mxu1  ;;  %v12444_v55 = vpop.f32.mrf.mxu0 }
 0x2d4   :  { %v13969_v24 = vadd.f32 %v13963_v47, %v2763_v3 }
 0x2d5   :  { %v2922_v45 = vpop.f32.mrf.mxu1  ;;  %v3144_v57 = vpop.f32.mrf.mxu0 }
 0x2d6   :  { %v2923_v35 = vadd.f32 %v2922_v45, %v2846_v32  ;;  %v5984_v19 = vsel %vm2314_vm2, %v13969_v24, -inf }
 0x2d7   :  { %v12439_v44 = vpop.f32.mrf.mxu1  ;;  %v12454_v21 = vpop.f32.mrf.mxu0  ;;  %5985 = vmax.xlane.f32.xlu1 %v5984_v19 }
 0x2d8   :  { %v2997_v26 = vadd.f32 %v2996_v51, %v2923_v35 }
 0x2d9   :  { %v3070_v36 = vpop.f32.mrf.mxu1 }
 0x2da   :  { %v3071_v37 = vadd.f32 %v3070_v36, %v2997_v26 }
 0x2db   :  { %v12449_v50 = vpop.f32.mrf.mxu1 }
 0x2dc   :  { %v3145_v59 = vadd.f32 %v3144_v57, %v3071_v37 }
 0x2dd   :  { %v3300_v60 = vpop.f32.mrf.mxu0  ;;  %v3216_v53 = vpop.f32.mrf.mxu1 }
 0x2de   :  { %v3217_v63 = vadd.f32 %v3216_v53, %v3145_v59 }
 0x2df   :  { %v12464_v0 = vpop.f32.mrf.mxu0  ;;  %v12459_v2 = vpop.f32.mrf.mxu1 }
 0x2e0   :  { %v13976_v13 = vadd.f32 %v13973_v58, %v3217_v63 }
 0x2e1   :  { %v3450_v46 = vpop.f32.mrf.mxu0 }
 0x2e2   :  { %v5987_v10 = vsel %vm2314_vm2, %v13976_v13, -inf }
 0x2e3   :  { %v12474_v4 = vpop.f32.mrf.mxu0  ;;  %5988 = vmax.xlane.f32.xlu0 %v5987_v10 }
 0x2e5   :  { %v3376_v15 = vpop.f32.mrf.mxu1  ;;  %v3598_v5 = vpop.f32.mrf.mxu0 }
 0x2e6   :  { %v3377_v6 = vadd.f32 %v3376_v15, %v3300_v60 }
 0x2e7   :  { %v12469_v11 = vpop.f32.mrf.mxu1  ;;  %v12484_v1 = vpop.f32.mrf.mxu0 }
 0x2e8   :  { %v3451_v14 = vadd.f32 %v3450_v46, %v3377_v6 }
 0x2e9   :  { %v3524_v12 = vpop.f32.mrf.mxu1  ;;  %v3754_v16 = vpop.f32.mrf.mxu0 }
 0x2ea   :  { %v3525_v17 = vadd.f32 %v3524_v12, %v3451_v14 }
 0x2eb   :  { %v12479_v18 = vpop.f32.mrf.mxu1  ;;  %v12494_v20 = vpop.f32.mrf.mxu0 }
 0x2ec   :  { %v3599_v22 = vadd.f32 %v3598_v5, %v3525_v17 }
 0x2ed   :  { %v3670_v23 = vpop.f32.mrf.mxu1  ;;  %v3904_v25 = vpop.f32.mrf.mxu0 }
 0x2ee   :  { %v3671_v27 = vadd.f32 %v3670_v23, %v3599_v22 }
 0x2ef   :  { %v12489_v29 = vpop.f32.mrf.mxu1  ;;  %v12504_v30 = vpop.f32.mrf.mxu0 }
 0x2f0   :  { %v13981_v31 = vadd.f32 %v13963_v47, %v3671_v27 }
 0x2f1   :  { %v3830_v32 = vpop.f32.mrf.mxu1  ;;  %v4052_v34 = vpop.f32.mrf.mxu0 }
 0x2f2   :  { %v3831_v39 = vadd.f32 %v3830_v32, %v3754_v16  ;;  %v5990_v40 = vsel %vm2314_vm2, %v13981_v31, -inf }
 0x2f3   :  { %v12499_v48 = vpop.f32.mrf.mxu1  ;;  %v12514_v9 = vpop.f32.mrf.mxu0  ;;  %5991 = vmax.xlane.f32.xlu0 %v5990_v40 }
 0x2f4   :  { %v3905_v49 = vadd.f32 %v3904_v25, %v3831_v39 }
 0x2f5   :  { %v3978_v51 = vpop.f32.mrf.mxu1 }
 0x2f6   :  { %v3979_v52 = vadd.f32 %v3978_v51, %v3905_v49 }
 0x2f7   :  { %v12509_v3 = vpop.f32.mrf.mxu1 }
 0x2f8   :  { %v4053_v54 = vadd.f32 %v4052_v34, %v3979_v52 }
 0x2f9   :  { %v4124_v55 = vpop.f32.mrf.mxu1 }
 0x2fa   :  { %v4125_v56 = vadd.f32 %v4124_v55, %v4053_v54 }
 0x2fb   :  { %v4208_v45 = vpop.f32.mrf.mxu0  ;;  %v12519_v57 = vpop.f32.mrf.mxu1 }
 0x2fc   :  { %v13986_v35 = vadd.f32 %v13973_v58, %v4125_v56 }
 0x2fd   :  { %v12524_v19 = vpop.f32.mrf.mxu0 }
 0x2fe   :  { %v5993_v44 = vsel %vm2314_vm2, %v13986_v35, -inf }
 0x2ff   :  { %v4358_v21 = vpop.f32.mrf.mxu0  ;;  %5994 = vmax.xlane.f32.xlu1 %v5993_v44 }
 0x301   :  { %v12534_v26 = vpop.f32.mrf.mxu0 }
 0x303   :  { %v4284_v28 = vpop.f32.mrf.mxu1  ;;  %v4506_v36 = vpop.f32.mrf.mxu0 }
 0x304   :  { %v4285_v37 = vadd.f32 %v4284_v28, %v4208_v45 }
 0x305   :  { %v12529_v50 = vpop.f32.mrf.mxu1  ;;  %v12544_v59 = vpop.f32.mrf.mxu0 }
 0x306   :  { %v4359_v60 = vadd.f32 %v4358_v21, %v4285_v37 }
 0x307   :  { %v4432_v53 = vpop.f32.mrf.mxu1  ;;  %v4662_v63 = vpop.f32.mrf.mxu0 }
 0x308   :  { %v4433_v0 = vadd.f32 %v4432_v53, %v4359_v60 }
 0x309   :  { %v12539_v2 = vpop.f32.mrf.mxu1  ;;  %v12554_v46 = vpop.f32.mrf.mxu0 }
 0x30a   :  { %v4507_v10 = vadd.f32 %v4506_v36, %v4433_v0 }
 0x30b   :  { %v4578_v4 = vpop.f32.mrf.mxu1  ;;  %v4812_v15 = vpop.f32.mrf.mxu0 }
 0x30c   :  { %v4579_v5 = vadd.f32 %v4578_v4, %v4507_v10 }
 0x30d   :  { %v12549_v6 = vpop.f32.mrf.mxu1  ;;  %v12564_v11 = vpop.f32.mrf.mxu0 }
 0x30e   :  { %v13991_v1 = vadd.f32 %v13963_v47, %v4579_v5 }
 0x30f   :  { %v4738_v14 = vpop.f32.mrf.mxu1  ;;  %v4960_v12 = vpop.f32.mrf.mxu0 }
 0x310   :  { %v4739_v16 = vadd.f32 %v4738_v14, %v4662_v63  ;;  %v5996_v17 = vsel %vm2314_vm2, %v13991_v1, -inf }
 0x311   :  { %v12559_v18 = vpop.f32.mrf.mxu1  ;;  %v12574_v20 = vpop.f32.mrf.mxu0  ;;  %5997 = vmax.xlane.f32.xlu0 %v5996_v17 }
 0x312   :  { %v4813_v22 = vadd.f32 %v4812_v15, %v4739_v16 }
 0x313   :  { %v4886_v23 = vpop.f32.mrf.mxu1 }
 0x314   :  { %v4887_v25 = vadd.f32 %v4886_v23, %v4813_v22 }
 0x315   :  { %v12569_v27 = vpop.f32.mrf.mxu1 }
 0x316   :  { %v4961_v29 = vadd.f32 %v4960_v12, %v4887_v25 }
 0x317   :  { %v5032_v30 = vpop.f32.mrf.mxu1 }
 0x318   :  { %v5033_v32 = vadd.f32 %v5032_v30, %v4961_v29 }
 0x319   :  { %v12579_v34 = vpop.f32.mrf.mxu1 }
 0x31a   :  { %v13996_v39 = vadd.f32 %v13973_v58, %v5033_v32 }
 0x31c   :  { %v5999_v40 = vsel %vm2314_vm2, %v13996_v39, -inf }
 0x31d   :  { %6000 = vmax.xlane.f32.xlu1 %v5999_v40 }
 0x33a   :  { %v5116_v48 = vpop.f32.mrf.mxu0 }
 0x33c   :  { %v12584_v9 = vpop.f32.mrf.mxu0 }
 0x33e   :  { %v5266_v49 = vpop.f32.mrf.mxu0 }
 0x340   :  { %v12594_v51 = vpop.f32.mrf.mxu0 }
 0x342   :  { %v5192_v52 = vpop.f32.mrf.mxu1  ;;  %v5414_v3 = vpop.f32.mrf.mxu0 }
 0x343   :  { %v5193_v54 = vadd.f32 %v5192_v52, %v5116_v48 }
 0x344   :  { %v12589_v55 = vpop.f32.mrf.mxu1  ;;  %v12604_v56 = vpop.f32.mrf.mxu0 }
 0x345   :  { %v5267_v45 = vadd.f32 %v5266_v49, %v5193_v54 }
 0x346   :  { %v5340_v57 = vpop.f32.mrf.mxu1  ;;  %v5570_v19 = vpop.f32.mrf.mxu0 }
 0x347   :  { %v5341_v44 = vadd.f32 %v5340_v57, %v5267_v45 }
 0x348   :  { %v12599_v21 = vpop.f32.mrf.mxu1  ;;  %v12614_v26 = vpop.f32.mrf.mxu0 }
 0x349   :  { %v5415_v28 = vadd.f32 %v5414_v3, %v5341_v44 }
 0x34a   :  { %v5486_v36 = vpop.f32.mrf.mxu1  ;;  %v5720_v37 = vpop.f32.mrf.mxu0 }
 0x34b   :  { %v5487_v50 = vadd.f32 %v5486_v36, %v5415_v28 }
 0x34c   :  { %v12609_v59 = vpop.f32.mrf.mxu1  ;;  %v12624_v60 = vpop.f32.mrf.mxu0 }
 0x34d   :  { %v14001_v53 = vadd.f32 %v13963_v47, %v5487_v50 }
 0x34e   :  { %v5646_v63 = vpop.f32.mrf.mxu1  ;;  %v5868_v0 = vpop.f32.mrf.mxu0 }
 0x34f   :  { %v5647_v2 = vadd.f32 %v5646_v63, %v5570_v19  ;;  %v6002_v46 = vsel %vm2314_vm2, %v14001_v53, -inf }
 0x350   :  { %v12619_v10 = vpop.f32.mrf.mxu1  ;;  %v12634_v4 = vpop.f32.mrf.mxu0  ;;  %6003 = vmax.xlane.f32.xlu0 %v6002_v46 }
 0x351   :  { %v5721_v15 = vadd.f32 %v5720_v37, %v5647_v2 }
 0x352   :  { %v5794_v5 = vpop.f32.mrf.mxu1 }
 0x353   :  { %v5795_v6 = vadd.f32 %v5794_v5, %v5721_v15 }
 0x354   :  { %v12629_v11 = vpop.f32.mrf.mxu1 }
 0x355   :  { %v5869_v14 = vadd.f32 %v5868_v0, %v5795_v6 }
 0x356   :  { %v5940_v12 = vpop.f32.mrf.mxu1 }
 0x357   :  { %v5941_v16 = vadd.f32 %v5940_v12, %v5869_v14 }
 0x358   :  { %v12639_v17 = vpop.f32.mrf.mxu1 }
 0x359   :  { %v5983_v47 = vadd.f32 %v13973_v58, %v5941_v16 }
 0x35b   :  { %v6005_v18 = vsel %vm2314_vm2, %v5983_v47, -inf }
 0x35c   :  { %6006 = vmax.xlane.f32.xlu1 %v6005_v18 }
 0x360   :  { %v5986_v20 = vpop.xlane.xlu1 %5985 }
 0x361   :  { %v6008_v22 = vsub.f32 %v13969_v24, %v5986_v20 }
 0x363   :  { %v6016_v23 = vmul.f32 1.442695, %v6008_v22 }
 0x365   :  { %13015 = vpow2.f32 %v6016_v23 }
 0x36c   :  { %v5989_v25 = vpop.xlane.xlu0 %5988 }
 0x36d   :  { %v6009_v27 = vsub.f32 %v13976_v13, %v5989_v25 }
 0x36f   :  { %v6018_v29 = vmul.f32 1.442695, %v6009_v27 }
 0x371   :  { %13017 = vpow2.f32 %v6018_v29 }
 0x372   :  { %v13016_v30 = vpop.eup %13015 }
 0x373   :  { %v6032_v32 = vsel %vm2314_vm2, %v13016_v30, 0.0 }
 0x374   :  { %6033 = vadd.xlane.f32.xlu0 %v6032_v32 }
 0x37c   :  { %v5992_v24 = vpop.xlane.xlu0 %5991 }
 0x37d   :  { %v6010_v13 = vsub.f32 %v13981_v31, %v5992_v24 }
 0x37e   :  { %v14010_v34 = vpop.eup %13017 }
 0x37f   :  { %v6035_v58 = vsel %vm2314_vm2, %v14010_v34, 0.0  ;;  %v6020_v48 = vmul.f32 1.442695, %v6010_v13 }
 0x380   :  { %6036 = vadd.xlane.f32.xlu1 %v6035_v58 }
 0x381   :  { %13019 = vpow2.f32 %v6020_v48 }
 0x388   :  { %v5995_v40 = vpop.xlane.xlu1 %5994 }
 0x389   :  { %v6011_v9 = vsub.f32 %v13986_v35, %v5995_v40 }
 0x38a   :  { %6526 = vrot.lane.b32.xlu0 %v13578_v8, %s13144_s2 }
 0x38b   :  { %v6022_v51 = vmul.f32 1.442695, %v6011_v9 }
 0x38d   :  { %13021 = vpow2.f32 %v6022_v51 }
 0x38e   :  { %6979 = vrot.lane.b32.xlu0 %v13596_v43, %s13144_s2  ;;  %v14023_v3 = vpop.eup %13019 }
 0x38f   :  { %v6038_v43 = vsel %vm2314_vm2, %v14023_v3, 0.0 }
 0x391   :  { %6073 = vrot.lane.b32.xlu1 %v13576_v7, %s13144_s2 }
 0x39a   :  { %v5998_v49 = vpop.xlane.xlu0 %5997  ;;  %v14027_v7 = vpop.eup %13021 }
 0x39b   :  { %v6012_v52 = vsub.f32 %v13991_v1, %v5998_v49  ;;  %v6041_v31 = vsel %vm2314_vm2, %v14027_v7, 0.0 }
 0x39d   :  { %v6024_v8 = vmul.f32 1.442695, %v6012_v52 }
 0x39f   :  { %13023 = vpow2.f32 %v6024_v8 }
 0x3a6   :  { %v6001_v54 = vpop.xlane.xlu1 %6000 }
 0x3a7   :  { %v6013_v55 = vsub.f32 %v13996_v39, %v6001_v54 }
 0x3a9   :  { %v6026_v56 = vmul.f32 1.442695, %v6013_v55 }
 0x3ab   :  { %13025 = vpow2.f32 %v6026_v56 }
 0x3ac   :  { %v14031_v35 = vpop.eup %13023 }
 0x3ad   :  { %6039 = vadd.xlane.f32.xlu0 %v6038_v43  ;;  %v6044_v1 = vsel %vm2314_vm2, %v14031_v35, 0.0 }
 0x3b1   :  { %6042 = vadd.xlane.f32.xlu0 %v6041_v31 }
 0x3b5   :  { %6045 = vadd.xlane.f32.xlu1 %v6044_v1 }
 0x3b8   :  { %v14041_v44 = vpop.eup %13025 }
 0x3b9   :  { %v6047_v26 = vsel %vm2314_vm2, %v14041_v44, 0.0 }
 0x3c6   :  { %7432 = vrot.lane.b32.xlu1 %v13594_v41, %s13144_s2 }
 0x3c7   :  { %7885 = vrot.lane.b32.xlu0 %v13616_v61, %s13144_s2 }
 0x3d9   :  { %v6004_v45 = vpop.xlane.xlu0 %6003 }
 0x3da   :  { %v6014_v57 = vsub.f32 %v14001_v53, %v6004_v45 }
 0x3dc   :  { %v6028_v19 = vmul.f32 1.442695, %v6014_v57 }
 0x3de   :  { %13027 = vpow2.f32 %v6028_v19 }
 0x3e5   :  { %v6007_v21 = vpop.xlane.xlu1 %6006 }
 0x3e6   :  { %v6015_v41 = vsub.f32 %v5983_v47, %v6007_v21  ;;  %6048 = vadd.xlane.f32.xlu0 %v6047_v26 }
 0x3e8   :  { %v6030_v28 = vmul.f32 1.442695, %v6015_v41 }
 0x3ea   :  { %13029 = vpow2.f32 %v6030_v28 }
 0x3eb   :  { %v14045_v61 = vpop.eup %13027 }
 0x3ec   :  { %v6050_v39 = vsel %vm2314_vm2, %v14045_v61, 0.0 }
 0x3ed   :  { %6051 = vadd.xlane.f32.xlu0 %v6050_v39 }
 0x3f7   :  { %v14049_v36 = vpop.eup %13029 }
 0x3f8   :  { %v6053_v37 = vsel %vm2314_vm2, %v14049_v36, 0.0 }
 0x3f9   :  { %6054 = vadd.xlane.f32.xlu1 %v6053_v37 }
 0x3fd   :  { %v6034_v50 = vpop.xlane.xlu0 %6033 }
 0x3fe   :  { %13031 = vrcp.f32 %v6034_v50 }
 0x401   :  { %v6527_v0 = vpop.permute.xlu0 %6526 }
 0x402   :  { %v6563_v15 = vand.u32 4294901760, %v6527_v0 }
 0x403   :  { %8338 = vrot.lane.b32.xlu0 %v13618_v62, %s13144_s2 }
 0x404   :  { %v6640_v11 = vsub.f32 %v6527_v0, %v6563_v15 }
 0x405   :  { %v6980_v18 = vpop.permute.xlu0 %6979 }
 0x406   :  { %v6641_v47 = vand.u32 4294901760, %v6640_v11  ;;  %v14069_v25 = vand.u32 4294901760, %v6980_v18 }
 0x407   :  { %8791 = vrot.lane.b32.xlu0 %v13640_v38, %s13144_s2 }
 0x408   :  { %v6642_v23 = vsub.f32 %v6640_v11, %v6641_v47  ;;  %v14078_v32 = vsub.f32 %v6980_v18, %v14069_v25 }
 0x409   :  { %v6037_v59 = vpop.xlane.xlu1 %6036 }
 0x40a   :  { %13033 = vrcp.f32 %v6037_v59  ;;  %v7094_v24 = vand.u32 4294901760, %v14078_v32 }
 0x40b   :  { %v13032_v60 = vpop.eup %13031  ;;  %9244 = vrot.lane.b32.xlu0 %v13648_v42, %s13144_s2 }
 0x40c   :  { %v6057_v53 = vmul.f32 %v13032_v60, %v13016_v30  ;;  %v6643_v30 = vand.u32 4294901760, %v6642_v23  ;;  %v7095_v13 = vsub.f32 %v14078_v32, %v7094_v24 }
 0x40d   :  { %v6074_v63 = vpop.permute.xlu1 %6073 }
 0x40e   :  { %v6110_v2 = vand.u32 4294901760, %v6074_v63  ;;  %v6077_v46 = vsel %vm2314_vm2, %v6057_v53, 0  ;;  %v7096_v40 = vand.u32 4294901760, %v7095_v13 }
 0x40f   :  { %v6145_v10 = vand.u32 4294901760, %v6077_v46 }
 0x410   :  { %v6187_v4 = vsub.f32 %v6074_v63, %v6110_v2  ;;  %12641 = vmatpush3.msra.mxu0 %v6110_v2 }
 0x411   :  { %12650 = vmatprep.subr.mxu0 %v13140_v33  ;;  %v6146_v62 = vsub.f32 %v6077_v46, %v6145_v10 }
 0x412   :  { %v6188_v38 = vand.u32 4294901760, %v6187_v4 }
 0x413   :  { %v6147_v5 = vand.u32 4294901760, %v6146_v62 }
 0x414   :  { %v6189_v6 = vsub.f32 %v6187_v4, %v6188_v38 }
 0x415   :  { %v6148_v14 = vsub.f32 %v6146_v62, %v6147_v5 }
 0x416   :  { %v6190_v12 = vand.u32 4294901760, %v6189_v6 }
 0x417   :  { %v13034_v42 = vpop.eup %13033  ;;  %v6149_v16 = vand.u32 4294901760, %v6148_v14 }
 0x418   :  { %v6059_v17 = vmul.f32 %v13034_v42, %v14010_v34  ;;  %12646 = vmatpush3.msra.mxu1 %v6190_v12 }
 0x419   :  { %12643 = vmatmul.mubr.f32.vlgmr.msra.gmra.mxu0 %v6149_v16  ;;  %12648 = vmatmul.mubr.f32.vlgmr.msra.gmra.mxu1 %v6145_v10 }
 0x41a   :  { %12651 = vmatpush3.msra.mxu0 %v6187_v4  ;;  %12655 = vmatprep.subr.mxu1 %v13140_v33  ;;  %v6530_v20 = vsel %vm2314_vm2, %v6059_v17, 0 }
 0x41b   :  { %12656 = vmatpush3.msra.mxu1 %v6110_v2  ;;  %12652 = vmatprep.mubr.msk.f32.mxu0 %vm13142_vm1, %v13140_v33  ;;  %v6598_v22 = vand.u32 4294901760, %v6530_v20 }
 0x41c   :  { %12657 = vmatprep.mubr.msk.f32.mxu1 %vm13142_vm1, %v13140_v33  ;;  %12660 = vmatprep.subr.mxu0 %v13140_v33 }
 0x41d   :  { %12665 = vmatprep.subr.mxu1 %v13140_v33  ;;  %12653 = vmatmul.mubr.f32.vlgmr.msra.gmra.mxu0 %v6146_v62  ;;  %v6599_v27 = vsub.f32 %v6530_v20, %v6598_v22 }
 0x41e   :  { %12658 = vmatmul.mubr.f32.vlgmr.msra.gmra.mxu1 %v6147_v5  ;;  %12661 = vmatpush3.msra.mxu0 %v6188_v38 }
 0x41f   :  { %12666 = vmatpush3.msra.mxu1 %v6110_v2  ;;  %12662 = vmatprep.mubr.msk.f32.mxu0 %vm13142_vm1, %v13140_v33  ;;  %v6600_v29 = vand.u32 4294901760, %v6599_v27 }
 0x420   :  { %12667 = vmatprep.mubr.msk.f32.mxu1 %vm13142_vm1, %v13140_v33  ;;  %12670 = vmatprep.subr.mxu0 %v13140_v33 }
 0x421   :  { %12675 = vmatprep.subr.mxu1 %v13140_v33  ;;  %12663 = vmatmul.mubr.f32.vlgmr.msra.gmra.mxu0 %v6145_v10  ;;  %v6601_v34 = vsub.f32 %v6599_v27, %v6600_v29 }
 0x422   :  { %12668 = vmatmul.mubr.f32.vlgmr.msra.gmra.mxu1 %v6145_v10  ;;  %12671 = vmatpush3.msra.mxu0 %v6563_v15 }
 0x423   :  { %12676 = vmatpush3.msra.mxu1 %v6643_v30  ;;  %12672 = vmatprep.mubr.msk.f32.mxu0 %vm13142_vm1, %v13140_v33  ;;  %v6602_v58 = vand.u32 4294901760, %v6601_v34 }
 0x424   :  { %12677 = vmatprep.mubr.msk.f32.mxu1 %vm13142_vm1, %v13140_v33  ;;  %12680 = vmatprep.subr.mxu0 %v13140_v33 }
 0x425   :  { %12685 = vmatprep.subr.mxu1 %v13140_v33  ;;  %12673 = vmatmul.mubr.f32.vlgmr.msra.gmra.mxu0 %v6602_v58 }
 0x426   :  { %12678 = vmatmul.mubr.f32.vlgmr.msra.gmra.mxu1 %v6598_v22  ;;  %12681 = vmatpush3.msra.mxu0 %v6640_v11 }
 0x427   :  { %12686 = vmatpush3.msra.mxu1 %v6563_v15  ;;  %12682 = vmatprep.mubr.msk.f32.mxu0 %vm13142_vm1, %v13140_v33 }
 0x428   :  { %12687 = vmatprep.mubr.msk.f32.mxu1 %vm13142_vm1, %v13140_v33  ;;  %12690 = vmatprep.subr.mxu0 %v13140_v33 }
 0x429   :  { %12695 = vmatprep.subr.mxu1 %v13140_v33  ;;  %12683 = vmatmul.mubr.f32.vlgmr.msra.gmra.mxu0 %v6599_v27 }
 0x42a   :  { %12688 = vmatmul.mubr.f32.vlgmr.msra.gmra.mxu1 %v6600_v29  ;;  %12691 = vmatpush3.msra.mxu0 %v6641_v47 }
 0x42b   :  { %12696 = vmatpush3.msra.mxu1 %v6563_v15  ;;  %12692 = vmatprep.mubr.msk.f32.mxu0 %vm13142_vm1, %v13140_v33 }
 0x42c   :  { %12697 = vmatprep.mubr.msk.f32.mxu1 %vm13142_vm1, %v13140_v33  ;;  %12700 = vmatprep.subr.mxu0 %v13140_v33 }
 0x42d   :  { %12705 = vmatprep.subr.mxu1 %v13140_v33  ;;  %12693 = vmatmul.mubr.f32.vlgmr.msra.gmra.mxu0 %v6598_v22 }
 0x42e   :  { %12698 = vmatmul.mubr.f32.vlgmr.msra.gmra.mxu1 %v6598_v22  ;;  %12701 = vmatpush3.msra.mxu0 %v14069_v25 }
 0x42f   :  { %12706 = vmatpush3.msra.mxu1 %v7096_v40  ;;  %12707 = vmatprep.mubr.msk.f32.mxu1 %vm13142_vm1, %v13140_v33 }
 0x430   :  { %12715 = vmatprep.subr.mxu1 %v13140_v33  ;;  %12702 = vmatprep.mubr.msk.f32.mxu0 %vm13142_vm1, %v13140_v33 }
 0x431   :  { %12710 = vmatprep.subr.mxu0 %v13140_v33 }
 0x436   :  { %v6040_v48 = vpop.xlane.xlu0 %6039 }
 0x437   :  { %13035 = vrcp.f32 %v6040_v48 }
 0x43a   :  { %v6043_v9 = vpop.xlane.xlu0 %6042 }
 0x43b   :  { %13037 = vrcp.f32 %v6043_v9 }
 0x43e   :  { %v6046_v49 = vpop.xlane.xlu1 %6045  ;;  %v7886_v57 = vpop.permute.xlu0 %7885 }
 0x43f   :  { %13039 = vrcp.f32 %v6046_v49  ;;  %v14123_v41 = vand.u32 4294901760, %v7886_v57 }
 0x441   :  { %v14134_v59 = vsub.f32 %v7886_v57, %v14123_v41 }
 0x442   :  { %v7433_v51 = vpop.permute.xlu1 %7432 }
 0x443   :  { %v7469_v52 = vand.u32 4294901760, %v7433_v51  ;;  %v8000_v0 = vand.u32 4294901760, %v14134_v59 }
 0x444   :  { %v13036_v8 = vpop.eup %13035 }
 0x445   :  { %v14110_v43 = vsub.f32 %v7433_v51, %v7469_v52  ;;  %v6061_v31 = vmul.f32 %v13036_v8, %v14023_v3  ;;  %v8001_v10 = vsub.f32 %v14134_v59, %v8000_v0 }
 0x447   :  { %v6983_v1 = vsel %vm2314_vm2, %v6061_v31, 0  ;;  %v7547_v56 = vand.u32 4294901760, %v14110_v43  ;;  %v8002_v62 = vand.u32 4294901760, %v8001_v10 }
 0x448   :  { %v13038_v54 = vpop.eup %13037  ;;  %v7051_v55 = vand.u32 4294901760, %v6983_v1 }
 0x449   :  { %v6063_v45 = vmul.f32 %v13038_v54, %v14027_v7  ;;  %v7548_v7 = vsub.f32 %v14110_v43, %v7547_v56 }
 0x44a   :  { %v7052_v19 = vsub.f32 %v6983_v1, %v7051_v55  ;;  %12708 = vmatmul.mubr.f32.vlgmr.msra.gmra.mxu1 %v7051_v55  ;;  %v9696_v1 = vld [vmem:[#allocation7] sm:$0xff] }
 0x44b   :  { %12716 = vmatpush3.msra.mxu1 %v14069_v25  ;;  %12717 = vmatprep.mubr.msk.f32.mxu1 %vm13142_vm1, %v13140_v33  ;;  %v7436_v21 = vsel %vm2314_vm2, %v6063_v45, 0  ;;  %v7549_v60 = vand.u32 4294901760, %v7548_v7 }
 0x44c   :  { %12725 = vmatprep.subr.mxu1 %v13140_v33  ;;  %v7053_v3 = vand.u32 4294901760, %v7052_v19  ;;  %v14121_v26 = vand.u32 4294901760, %v7436_v21  ;;  %v13040_v28 = vpop.eup %13039 }
 0x44d   :  { %v6065_v53 = vmul.f32 %v13040_v28, %v14031_v35 }
 0x44e   :  { %12718 = vmatmul.mubr.f32.vlgmr.msra.gmra.mxu1 %v7053_v3  ;;  %v7054_v39 = vsub.f32 %v7052_v19, %v7053_v3  ;;  %v7505_v50 = vsub.f32 %v7436_v21, %v14121_v26 }
 0x44f   :  { %12726 = vmatpush3.msra.mxu1 %v14069_v25  ;;  %12727 = vmatprep.mubr.msk.f32.mxu1 %vm13142_vm1, %v13140_v33  ;;  %v7889_v35 = vsel %vm2314_vm2, %v6065_v53, 0 }
 0x450   :  { %12735 = vmatprep.subr.mxu1 %v13140_v33  ;;  %v7055_v37 = vand.u32 4294901760, %v7054_v39  ;;  %v7506_v63 = vand.u32 4294901760, %v7505_v50  ;;  %v7957_v46 = vand.u32 4294901760, %v7889_v35 }
 0x452   :  { %12703 = vmatmul.mubr.f32.vlgmr.msra.gmra.mxu0 %v7055_v37  ;;  %12728 = vmatmul.mubr.f32.vlgmr.msra.gmra.mxu1 %v7051_v55  ;;  %v7507_v2 = vsub.f32 %v7505_v50, %v7506_v63  ;;  %v7958_v15 = vsub.f32 %v7889_v35, %v7957_v46 }
 0x453   :  { %12711 = vmatpush3.msra.mxu0 %v14078_v32  ;;  %12736 = vmatpush3.msra.mxu1 %v7549_v60 }
 0x454   :  { %12712 = vmatprep.mubr.msk.f32.mxu0 %vm13142_vm1, %v13140_v33  ;;  %12720 = vmatprep.subr.mxu0 %v13140_v33  ;;  %v7508_v4 = vand.u32 4294901760, %v7507_v2  ;;  %v7959_v38 = vand.u32 4294901760, %v7958_v15 }
 0x455   :  { %12737 = vmatprep.mubr.msk.f32.mxu1 %vm13142_vm1, %v13140_v33  ;;  %12745 = vmatprep.subr.mxu1 %v13140_v33 }
 0x456   :  { %12713 = vmatmul.mubr.f32.vlgmr.msra.gmra.mxu0 %v7052_v19  ;;  %12738 = vmatmul.mubr.f32.vlgmr.msra.gmra.mxu1 %v14121_v26  ;;  %v7960_v5 = vsub.f32 %v7958_v15, %v7959_v38 }
 0x457   :  { %12721 = vmatpush3.msra.mxu0 %v7094_v24  ;;  %12746 = vmatpush3.msra.mxu1 %v7469_v52 }
 0x458   :  { %12722 = vmatprep.mubr.msk.f32.mxu0 %vm13142_vm1, %v13140_v33  ;;  %12730 = vmatprep.subr.mxu0 %v13140_v33  ;;  %v7961_v6 = vand.u32 4294901760, %v7960_v5 }
 0x459   :  { %12747 = vmatprep.mubr.msk.f32.mxu1 %vm13142_vm1, %v13140_v33  ;;  %12755 = vmatprep.subr.mxu1 %v13140_v33 }
 0x45a   :  { %12723 = vmatmul.mubr.f32.vlgmr.msra.gmra.mxu0 %v7051_v55  ;;  %12748 = vmatmul.mubr.f32.vlgmr.msra.gmra.mxu1 %v7506_v63 }
 0x45b   :  { %12731 = vmatpush3.msra.mxu0 %v7469_v52  ;;  %12756 = vmatpush3.msra.mxu1 %v7469_v52 }
 0x45c   :  { %12732 = vmatprep.mubr.msk.f32.mxu0 %vm13142_vm1, %v13140_v33  ;;  %12740 = vmatprep.subr.mxu0 %v13140_v33 }
 0x45d   :  { %12757 = vmatprep.mubr.msk.f32.mxu1 %vm13142_vm1, %v13140_v33  ;;  %12765 = vmatprep.subr.mxu1 %v13140_v33 }
 0x45e   :  { %12733 = vmatmul.mubr.f32.vlgmr.msra.gmra.mxu0 %v7508_v4  ;;  %12758 = vmatmul.mubr.f32.vlgmr.msra.gmra.mxu1 %v14121_v26 }
 0x45f   :  { %12741 = vmatpush3.msra.mxu0 %v14110_v43  ;;  %12766 = vmatpush3.msra.mxu1 %v8002_v62 }
 0x460   :  { %12742 = vmatprep.mubr.msk.f32.mxu0 %vm13142_vm1, %v13140_v33  ;;  %12750 = vmatprep.subr.mxu0 %v13140_v33 }
 0x461   :  { %12767 = vmatprep.mubr.msk.f32.mxu1 %vm13142_vm1, %v13140_v33  ;;  %12775 = vmatprep.subr.mxu1 %v13140_v33 }
 0x462   :  { %12743 = vmatmul.mubr.f32.vlgmr.msra.gmra.mxu0 %v7505_v50  ;;  %12768 = vmatmul.mubr.f32.vlgmr.msra.gmra.mxu1 %v7957_v46 }
 0x463   :  { %12751 = vmatpush3.msra.mxu0 %v7547_v56  ;;  %12776 = vmatpush3.msra.mxu1 %v14123_v41  ;;  %v14234_v56 = vand.u32 4294901760, %v9696_v1 }
 0x464   :  { %12752 = vmatprep.mubr.msk.f32.mxu0 %vm13142_vm1, %v13140_v33  ;;  %12760 = vmatprep.subr.mxu0 %v13140_v33 }
 0x465   :  { %12777 = vmatprep.mubr.msk.f32.mxu1 %vm13142_vm1, %v13140_v33  ;;  %12785 = vmatprep.subr.mxu1 %v13140_v33  ;;  %v14248_v3 = vsub.f32 %v9696_v1, %v14234_v56 }
 0x466   :  { %12753 = vmatmul.mubr.f32.vlgmr.msra.gmra.mxu0 %v14121_v26  ;;  %12778 = vmatmul.mubr.f32.vlgmr.msra.gmra.mxu1 %v7959_v38 }
 0x467   :  { %12761 = vmatpush3.msra.mxu0 %v14123_v41  ;;  %12786 = vmatpush3.msra.mxu1 %v14123_v41  ;;  %v14260_v28 = vand.u32 4294901760, %v14248_v3 }
 0x468   :  { %12762 = vmatprep.mubr.msk.f32.mxu0 %vm13142_vm1, %v13140_v33  ;;  %12770 = vmatprep.subr.mxu0 %v13140_v33 }
 0x469   :  { %12787 = vmatprep.mubr.msk.f32.mxu1 %vm13142_vm1, %v13140_v33  ;;  %12795 = vmatprep.subr.mxu1 %v13140_v33  ;;  %v9826_v50 = vsub.f32 %v14248_v3, %v14260_v28 }
 0x46a   :  { %12763 = vmatmul.mubr.f32.vlgmr.msra.gmra.mxu0 %v7961_v6  ;;  %12788 = vmatmul.mubr.f32.vlgmr.msra.gmra.mxu1 %v7957_v46 }
 0x46b   :  { %12771 = vmatpush3.msra.mxu0 %v14134_v59  ;;  %12772 = vmatprep.mubr.msk.f32.mxu0 %vm13142_vm1, %v13140_v33  ;;  %v9827_v60 = vand.u32 4294901760, %v9826_v50 }
 0x46c   :  { %12780 = vmatprep.subr.mxu0 %v13140_v33  ;;  %12797 = vmatprep.mubr.msk.f32.mxu1 %vm13142_vm1, %v13140_v33 }
 0x46e   :  { %12773 = vmatmul.mubr.f32.vlgmr.msra.gmra.mxu0 %v7958_v15 }
 0x46f   :  { %12781 = vmatpush3.msra.mxu0 %v8000_v0  ;;  %v6049_v11 = vpop.xlane.xlu0 %6048  ;;  %12782 = vmatprep.mubr.msk.f32.mxu0 %vm13142_vm1, %v13140_v33 }
 0x470   :  { %13041 = vrcp.f32 %v6049_v11  ;;  %12790 = vmatprep.subr.mxu0 %v13140_v33 }
 0x472   :  { %12783 = vmatmul.mubr.f32.vlgmr.msra.gmra.mxu0 %v7957_v46 }
 0x473   :  { %12792 = vmatprep.mubr.msk.f32.mxu0 %vm13142_vm1, %v13140_v33 }
 0x476   :  { %v6052_v14 = vpop.xlane.xlu0 %6051 }
 0x477   :  { %13043 = vrcp.f32 %v6052_v14 }
 0x47a   :  { %v8339_v12 = vpop.permute.xlu0 %8338 }
 0x47b   :  { %v8375_v42 = vand.u32 4294901760, %v8339_v12 }
 0x47d   :  { %v13042_v16 = vpop.eup %13041  ;;  %v8452_v17 = vsub.f32 %v8339_v12, %v8375_v42  ;;  %12791 = vmatpush3.msra.mxu0 %v8375_v42 }
 0x47e   :  { %v8792_v47 = vpop.permute.xlu0 %8791  ;;  %v6067_v18 = vmul.f32 %v13042_v16, %v14041_v44  ;;  %12800 = vmatprep.subr.mxu0 %v13140_v33  ;;  %v9697_v16 = vld [vmem:[#allocation7 + $0x8] sm:$0xff] }
 0x47f   :  { %v8453_v20 = vand.u32 4294901760, %v8452_v17  ;;  %v14201_v22 = vand.u32 4294901760, %v8792_v47 }
 0x480   :  { %v8342_v23 = vsel %vm2314_vm2, %v6067_v18, 0 }
 0x481   :  { %v8454_v25 = vsub.f32 %v8452_v17, %v8453_v20  ;;  %v14205_v27 = vsub.f32 %v8792_v47, %v14201_v22  ;;  %v8410_v29 = vand.u32 4294901760, %v8342_v23 }
 0x482   :  { %v6055_v30 = vpop.xlane.xlu1 %6054  ;;  %v9245_v13 = vpop.permute.xlu0 %9244 }
 0x483   :  { %v8455_v32 = vand.u32 4294901760, %v8454_v25  ;;  %13045 = vrcp.f32 %v6055_v30  ;;  %v8411_v58 = vsub.f32 %v8342_v23, %v8410_v29  ;;  %v8906_v24 = vand.u32 4294901760, %v14205_v27 }
 0x484   :  { %v13044_v34 = vpop.eup %13043  ;;  %v14219_v51 = vand.u32 4294901760, %v9245_v13  ;;  %v14300_v23 = vand.u32 4294901760, %v9697_v16 }
 0x485   :  { %12796 = vmatpush3.msra.mxu1 %v8455_v32  ;;  %v6069_v44 = vmul.f32 %v13044_v34, %v14045_v61  ;;  %v8412_v40 = vand.u32 4294901760, %v8411_v58  ;;  %v8907_v61 = vsub.f32 %v14205_v27, %v8906_v24 }
 0x486   :  { %12798 = vmatmul.mubr.f32.vlgmr.msra.gmra.mxu1 %v8410_v29  ;;  %12805 = vmatprep.subr.mxu1 %v13140_v33  ;;  %v14226_v31 = vsub.f32 %v9245_v13, %v14219_v51 }
 0x487   :  { %12806 = vmatpush3.msra.mxu1 %v8375_v42  ;;  %12807 = vmatprep.mubr.msk.f32.mxu1 %vm13142_vm1, %v13140_v33  ;;  %v8795_v48 = vsel %vm2314_vm2, %v6069_v44, 0  ;;  %v8413_v9 = vsub.f32 %v8411_v58, %v8412_v40  ;;  %v8908_v43 = vand.u32 4294901760, %v8907_v61  ;;  %v14303_v44 = vsub.f32 %v9697_v16, %v14300_v23 }
 0x488   :  { %12815 = vmatprep.subr.mxu1 %v13140_v33  ;;  %v14214_v49 = vand.u32 4294901760, %v8795_v48  ;;  %v9359_v45 = vand.u32 4294901760, %v14226_v31 }
 0x489   :  { %v8414_v52 = vand.u32 4294901760, %v8413_v9 }
 0x48a   :  { %12808 = vmatmul.mubr.f32.vlgmr.msra.gmra.mxu1 %v8412_v40  ;;  %v8864_v8 = vsub.f32 %v8795_v48, %v14214_v49  ;;  %v9360_v26 = vsub.f32 %v14226_v31, %v9359_v45 }
 0x48b   :  { %12816 = vmatpush3.msra.mxu1 %v8375_v42  ;;  %12817 = vmatprep.mubr.msk.f32.mxu1 %vm13142_vm1, %v13140_v33 }
 0x48c   :  { %12793 = vmatmul.mubr.f32.vlgmr.msra.gmra.mxu0 %v8414_v52  ;;  %12825 = vmatprep.subr.mxu1 %v13140_v33  ;;  %v8865_v54 = vand.u32 4294901760, %v8864_v8  ;;  %v9361_v39 = vand.u32 4294901760, %v9360_v26 }
 0x48d   :  { %12801 = vmatpush3.msra.mxu0 %v8452_v17  ;;  %12802 = vmatprep.mubr.msk.f32.mxu0 %vm13142_vm1, %v13140_v33 }
 0x48e   :  { %12810 = vmatprep.subr.mxu0 %v13140_v33  ;;  %12818 = vmatmul.mubr.f32.vlgmr.msra.gmra.mxu1 %v8410_v29  ;;  %v8866_v19 = vsub.f32 %v8864_v8, %v8865_v54 }
 0x48f   :  { %12826 = vmatpush3.msra.mxu1 %v8908_v43  ;;  %12827 = vmatprep.mubr.msk.f32.mxu1 %vm13142_vm1, %v13140_v33 }
 0x490   :  { %v13046_v55 = vpop.eup %13045  ;;  %12803 = vmatmul.mubr.f32.vlgmr.msra.gmra.mxu0 %v8411_v58  ;;  %12835 = vmatprep.subr.mxu1 %v13140_v33  ;;  %v8867_v41 = vand.u32 4294901760, %v8866_v19 }
 0x491   :  { %v6071_v57 = vmul.f32 %v13046_v55, %v14049_v36  ;;  %12811 = vmatpush3.msra.mxu0 %v8453_v20  ;;  %12812 = vmatprep.mubr.msk.f32.mxu0 %vm13142_vm1, %v13140_v33 }
 0x492   :  { %12820 = vmatprep.subr.mxu0 %v13140_v33  ;;  %12828 = vmatmul.mubr.f32.vlgmr.msra.gmra.mxu1 %v14214_v49 }
 0x493   :  { %12836 = vmatpush3.msra.mxu1 %v14201_v22  ;;  %12837 = vmatprep.mubr.msk.f32.mxu1 %vm13142_vm1, %v13140_v33  ;;  %v9248_v21 = vsel %vm2314_vm2, %v6071_v57, 0 }
 0x494   :  { %12813 = vmatmul.mubr.f32.vlgmr.msra.gmra.mxu0 %v8410_v29  ;;  %12845 = vmatprep.subr.mxu1 %v13140_v33  ;;  %v9316_v36 = vand.u32 4294901760, %v9248_v21 }
 0x495   :  { %12821 = vmatpush3.msra.mxu0 %v14201_v22  ;;  %12822 = vmatprep.mubr.msk.f32.mxu0 %vm13142_vm1, %v13140_v33 }
 0x496   :  { %12830 = vmatprep.subr.mxu0 %v13140_v33  ;;  %12838 = vmatmul.mubr.f32.vlgmr.msra.gmra.mxu1 %v8865_v54  ;;  %v9317_v7 = vsub.f32 %v9248_v21, %v9316_v36 }
 0x497   :  { %12846 = vmatpush3.msra.mxu1 %v14201_v22  ;;  %12847 = vmatprep.mubr.msk.f32.mxu1 %vm13142_vm1, %v13140_v33 }
 0x498   :  { %12823 = vmatmul.mubr.f32.vlgmr.msra.gmra.mxu0 %v8867_v41  ;;  %12855 = vmatprep.subr.mxu1 %v13140_v33  ;;  %v9318_v37 = vand.u32 4294901760, %v9317_v7 }
 0x499   :  { %12831 = vmatpush3.msra.mxu0 %v14205_v27  ;;  %12832 = vmatprep.mubr.msk.f32.mxu0 %vm13142_vm1, %v13140_v33 }
 0x49a   :  { %12840 = vmatprep.subr.mxu0 %v13140_v33  ;;  %12848 = vmatmul.mubr.f32.vlgmr.msra.gmra.mxu1 %v14214_v49  ;;  %v9319_v59 = vsub.f32 %v9317_v7, %v9318_v37 }
 0x49b   :  { %12856 = vmatpush3.msra.mxu1 %v9361_v39  ;;  %12857 = vmatprep.mubr.msk.f32.mxu1 %vm13142_vm1, %v13140_v33 }
 0x49c   :  { %12833 = vmatmul.mubr.f32.vlgmr.msra.gmra.mxu0 %v8864_v8  ;;  %12865 = vmatprep.subr.mxu1 %v13140_v33  ;;  %v9320_v53 = vand.u32 4294901760, %v9319_v59  ;;  %v14306_v8 = vand.u32 4294901760, %v14303_v44 }
 0x49d   :  { %12841 = vmatpush3.msra.mxu0 %v8906_v24  ;;  %12842 = vmatprep.mubr.msk.f32.mxu0 %vm13142_vm1, %v13140_v33 }
 0x49e   :  { %12850 = vmatprep.subr.mxu0 %v13140_v33  ;;  %12858 = vmatmul.mubr.f32.vlgmr.msra.gmra.mxu1 %v9316_v36  ;;  %v10321_v55 = vsub.f32 %v14303_v44, %v14306_v8 }
 0x49f   :  { %12866 = vmatpush3.msra.mxu1 %v14219_v51  ;;  %12867 = vmatprep.mubr.msk.f32.mxu1 %vm13142_vm1, %v13140_v33 }
 0x4a0   :  { %12843 = vmatmul.mubr.f32.vlgmr.msra.gmra.mxu0 %v14214_v49  ;;  %12875 = vmatprep.subr.mxu1 %v13140_v33  ;;  %v10322_v19 = vand.u32 4294901760, %v10321_v55 }
 0x4a1   :  { %12851 = vmatpush3.msra.mxu0 %v14219_v51  ;;  %12852 = vmatprep.mubr.msk.f32.mxu0 %vm13142_vm1, %v13140_v33 }
 0x4a2   :  { %12860 = vmatprep.subr.mxu0 %v13140_v33  ;;  %12868 = vmatmul.mubr.f32.vlgmr.msra.gmra.mxu1 %v9318_v37 }
 0x4a3   :  { %12876 = vmatpush3.msra.mxu1 %v14219_v51  ;;  %12877 = vmatprep.mubr.msk.f32.mxu1 %vm13142_vm1, %v13140_v33 }
 0x4a4   :  { %12853 = vmatmul.mubr.f32.vlgmr.msra.gmra.mxu0 %v9320_v53  ;;  %12885 = vmatprep.subr.mxu1 %v9827_v60 }
 0x4a5   :  { %12861 = vmatpush3.msra.mxu0 %v14226_v31  ;;  %12862 = vmatprep.mubr.msk.f32.mxu0 %vm13142_vm1, %v13140_v33 }
 0x4a6   :  { %12870 = vmatprep.subr.mxu0 %v13140_v33  ;;  %12878 = vmatmul.mubr.f32.vlgmr.msra.gmra.mxu1 %v9316_v36 }
 0x4a7   :  { %12886 = vmatpush3.msra.mxu1 %v9827_v60 }
 0x4a8   :  { %12863 = vmatmul.mubr.f32.vlgmr.msra.gmra.mxu0 %v9317_v7  ;;  %12895 = vmatprep.subr.mxu1 %v14234_v56 }
 0x4a9   :  { %12871 = vmatpush3.msra.mxu0 %v9359_v45  ;;  %12872 = vmatprep.mubr.msk.f32.mxu0 %vm13142_vm1, %v13140_v33 }
 0x4aa   :  { %12880 = vmatprep.subr.mxu0 %v14234_v56 }
 0x4ac   :  { %12873 = vmatmul.mubr.f32.vlgmr.msra.gmra.mxu0 %v9316_v36 }
 0x4ad   :  { %12881 = vmatpush3.msra.mxu0 %v14234_v56 }
 0x4ae   :  { %12890 = vmatprep.subr.mxu0 %v14248_v3 }
 0x4d9   :  { %v6151_v63 = vpop.f32.mrf.mxu0  ;;  %v6227_v0 = vpop.f32.mrf.mxu1 }
 0x4da   :  { %v6228_v46 = vadd.f32 %v6227_v0, %v6151_v63 }
 0x4db   :  { %v12644_v35 = vpop.f32.mrf.mxu0  ;;  %v12649_v2 = vpop.f32.mrf.mxu1 }
 0x4dd   :  { %v6301_v10 = vpop.f32.mrf.mxu0 }
 0x4de   :  { %v6302_v4 = vadd.f32 %v6301_v10, %v6228_v46  ;;  %v6375_v15 = vpop.f32.mrf.mxu1 }
 0x4df   :  { %v12654_v62 = vpop.f32.mrf.mxu0 }
 0x4e0   :  { %v6376_v38 = vadd.f32 %v6375_v15, %v6302_v4  ;;  %v12659_v5 = vpop.f32.mrf.mxu1 }
 0x4e1   :  { %v6449_v6 = vpop.f32.mrf.mxu0 }
 0x4e2   :  { %v6450_v33 = vadd.f32 %v6449_v6, %v6376_v38  ;;  %v6521_v11 = vpop.f32.mrf.mxu1  ;;  %v9698_v38 = vld [vmem:[#allocation7 + $0x10] sm:$0xff] }
 0x4e3   :  { %v12664_v14 = vpop.f32.mrf.mxu0 }
 0x4e4   :  { %v6522_v12 = vadd.f32 %v6521_v11, %v6450_v33  ;;  %v12669_v42 = vpop.f32.mrf.mxu1 }
 0x4e5   :  { %v6604_v17 = vpop.f32.mrf.mxu0  ;;  %v14324_v42 = vand.u32 4294901760, %v9698_v38 }
 0x4e6   :  { %v9701_v47 = vsel %vm2314_vm2, %v6522_v12, 0  ;;  %v6680_v18 = vpop.f32.mrf.mxu1 }
 0x4e7   :  { %v9772_v20 = vand.u32 4294901760, %v9701_v47  ;;  %v12674_v22 = vpop.f32.mrf.mxu0  ;;  %v6681_v25 = vadd.f32 %v6680_v18, %v6604_v17 }
 0x4e8   :  { %v12679_v27 = vpop.f32.mrf.mxu1 }
 0x4e9   :  { %v9773_v29 = vsub.f32 %v9701_v47, %v9772_v20  ;;  %v6754_v30 = vpop.f32.mrf.mxu0  ;;  %12887 = vmatprep.mubr.f32.mxu1 %v9772_v20 }
 0x4ea   :  { %v6755_v32 = vadd.f32 %v6754_v30, %v6681_v25  ;;  %v6828_v34 = vpop.f32.mrf.mxu1 }
 0x4eb   :  { %v12684_v58 = vpop.f32.mrf.mxu0  ;;  %v9774_v24 = vand.u32 4294901760, %v9773_v29 }
 0x4ec   :  { %v6829_v13 = vadd.f32 %v6828_v34, %v6755_v32  ;;  %v12689_v40 = vpop.f32.mrf.mxu1 }
 0x4ed   :  { %v6902_v48 = vpop.f32.mrf.mxu0  ;;  %v9775_v9 = vsub.f32 %v9773_v29, %v9774_v24 }
 0x4ee   :  { %v6903_v49 = vadd.f32 %v6902_v48, %v6829_v13  ;;  %v6974_v61 = vpop.f32.mrf.mxu1 }
 0x4ef   :  { %v12694_v51 = vpop.f32.mrf.mxu0  ;;  %v9776_v52 = vand.u32 4294901760, %v9775_v9 }
 0x4f0   :  { %v6975_v43 = vadd.f32 %v6974_v61, %v6903_v49  ;;  %v12699_v31 = vpop.f32.mrf.mxu1 }
 0x4f1   :  { %12882 = vmatprep.mubr.f32.mxu0 %v9776_v52 }
 0x4f2   :  { %v9704_v1 = vsel %vm2314_vm2, %v6975_v43, 0 }
 0x4f3   :  { %v9782_v54 = vand.u32 4294901760, %v9704_v1 }
 0x4f5   :  { %v9783_v45 = vsub.f32 %v9704_v1, %v9782_v54  ;;  %12888 = vmatmul.mubr.f32.vlgmr.msra.gmra.mxu1 %v9782_v54 }
 0x4f6   :  { %12897 = vmatprep.mubr.f32.mxu1 %v9774_v24  ;;  %12896 = vmatpush3.msra.mxu1 %v14234_v56 }
 0x4f7   :  { %v9784_v57 = vand.u32 4294901760, %v9783_v45  ;;  %12905 = vmatprep.subr.mxu1 %v14234_v56 }
 0x4f9   :  { %v9785_v21 = vsub.f32 %v9783_v45, %v9784_v57  ;;  %12898 = vmatmul.mubr.f32.vlgmr.msra.gmra.mxu1 %v9784_v57 }
 0x4fa   :  { %12907 = vmatprep.mubr.f32.mxu1 %v9772_v20  ;;  %12906 = vmatpush3.msra.mxu1 %v14234_v56 }
 0x4fb   :  { %v9786_v36 = vand.u32 4294901760, %v9785_v21  ;;  %12915 = vmatprep.subr.mxu1 %v10322_v19 }
 0x4fd   :  { %12883 = vmatmul.mubr.f32.vlgmr.msra.gmra.mxu0 %v9786_v36  ;;  %12908 = vmatmul.mubr.f32.vlgmr.msra.gmra.mxu1 %v9782_v54 }
 0x4fe   :  { %12892 = vmatprep.mubr.f32.mxu0 %v9773_v29  ;;  %12891 = vmatpush3.msra.mxu0 %v14248_v3  ;;  %v14329_v29 = vsub.f32 %v9698_v38, %v14324_v42 }
 0x4ff   :  { %12900 = vmatprep.subr.mxu0 %v14260_v28  ;;  %12916 = vmatpush3.msra.mxu1 %v10322_v19 }
 0x500   :  { %12925 = vmatprep.subr.mxu1 %v14300_v23  ;;  %v14332_v9 = vand.u32 4294901760, %v14329_v29 }
 0x501   :  { %12893 = vmatmul.mubr.f32.vlgmr.msra.gmra.mxu0 %v9783_v45 }
 0x502   :  { %12902 = vmatprep.mubr.f32.mxu0 %v9772_v20  ;;  %12901 = vmatpush3.msra.mxu0 %v14260_v28 }
 0x503   :  { %12910 = vmatprep.subr.mxu0 %v14300_v23 }
 0x505   :  { %12903 = vmatmul.mubr.f32.vlgmr.msra.gmra.mxu0 %v9782_v54  ;;  %v10816_v54 = vsub.f32 %v14329_v29, %v14332_v9 }
 0x506   :  { %12911 = vmatpush3.msra.mxu0 %v14300_v23 }
 0x507   :  { %12920 = vmatprep.subr.mxu0 %v14303_v44 }
 0x50a   :  { %v7133_v56 = vpop.f32.mrf.mxu1 }
 0x50c   :  { %v12709_v26 = vpop.f32.mrf.mxu1 }
 0x50e   :  { %v7281_v41 = vpop.f32.mrf.mxu1 }
 0x510   :  { %v12719_v3 = vpop.f32.mrf.mxu1 }
 0x512   :  { %v7057_v7 = vpop.f32.mrf.mxu0  ;;  %v7427_v39 = vpop.f32.mrf.mxu1 }
 0x513   :  { %v7134_v59 = vadd.f32 %v7133_v56, %v7057_v7  ;;  %v10817_v56 = vand.u32 4294901760, %v10816_v54 }
 0x514   :  { %v12704_v37 = vpop.f32.mrf.mxu0  ;;  %v12729_v50 = vpop.f32.mrf.mxu1 }
 0x516   :  { %v7207_v60 = vpop.f32.mrf.mxu0  ;;  %v7586_v53 = vpop.f32.mrf.mxu1 }
 0x517   :  { %v7208_v63 = vadd.f32 %v7207_v60, %v7134_v59 }
 0x518   :  { %v12714_v28 = vpop.f32.mrf.mxu0  ;;  %v12739_v0 = vpop.f32.mrf.mxu1 }
 0x519   :  { %v7282_v35 = vadd.f32 %v7281_v41, %v7208_v63 }
 0x51a   :  { %v7355_v2 = vpop.f32.mrf.mxu0  ;;  %v7734_v46 = vpop.f32.mrf.mxu1 }
 0x51b   :  { %v7356_v10 = vadd.f32 %v7355_v2, %v7282_v35  ;;  %v9699_v2 = vld [vmem:[#allocation7 + $0x18] sm:$0xff] }
 0x51c   :  { %v12724_v4 = vpop.f32.mrf.mxu0  ;;  %v12749_v15 = vpop.f32.mrf.mxu1 }
 0x51d   :  { %v7428_v62 = vadd.f32 %v7427_v39, %v7356_v10  ;;  %v14358_v15 = vand.u32 4294901760, %v9699_v2 }
 0x51e   :  { %v7510_v5 = vpop.f32.mrf.mxu0  ;;  %v7880_v6 = vpop.f32.mrf.mxu1 }
 0x51f   :  { %v10196_v33 = vsel %vm2314_vm2, %v7428_v62, 0  ;;  %v7587_v16 = vadd.f32 %v7586_v53, %v7510_v5 }
 0x520   :  { %v14322_v11 = vand.u32 4294901760, %v10196_v33  ;;  %v12734_v14 = vpop.f32.mrf.mxu0  ;;  %v12759_v12 = vpop.f32.mrf.mxu1 }
 0x521   :  { %v14361_v14 = vsub.f32 %v9699_v2, %v14358_v15 }
 0x522   :  { %v10268_v17 = vsub.f32 %v10196_v33, %v14322_v11  ;;  %v7660_v47 = vpop.f32.mrf.mxu0  ;;  %v8039_v18 = vpop.f32.mrf.mxu1  ;;  %12917 = vmatprep.mubr.f32.mxu1 %v14322_v11 }
 0x523   :  { %v7661_v20 = vadd.f32 %v7660_v47, %v7587_v16 }
 0x524   :  { %v12744_v22 = vpop.f32.mrf.mxu0  ;;  %v12769_v25 = vpop.f32.mrf.mxu1  ;;  %v10269_v27 = vand.u32 4294901760, %v10268_v17 }
 0x525   :  { %v7735_v30 = vadd.f32 %v7734_v46, %v7661_v20  ;;  %v14364_v22 = vand.u32 4294901760, %v14361_v14 }
 0x526   :  { %v7808_v32 = vpop.f32.mrf.mxu0  ;;  %v8187_v34 = vpop.f32.mrf.mxu1  ;;  %v10270_v58 = vsub.f32 %v10268_v17, %v10269_v27 }
 0x527   :  { %v7809_v24 = vadd.f32 %v7808_v32, %v7735_v30 }
 0x528   :  { %v12754_v13 = vpop.f32.mrf.mxu0  ;;  %v12779_v40 = vpop.f32.mrf.mxu1  ;;  %v10271_v48 = vand.u32 4294901760, %v10270_v58 }
 0x529   :  { %v7881_v49 = vadd.f32 %v7880_v6, %v7809_v24  ;;  %v11311_v13 = vsub.f32 %v14361_v14, %v14364_v22 }
 0x52a   :  { %v7963_v61 = vpop.f32.mrf.mxu0  ;;  %v8333_v51 = vpop.f32.mrf.mxu1  ;;  %12912 = vmatprep.mubr.f32.mxu0 %v10271_v48 }
 0x52b   :  { %v10199_v52 = vsel %vm2314_vm2, %v7881_v49, 0  ;;  %v8040_v55 = vadd.f32 %v8039_v18, %v7963_v61 }
 0x52c   :  { %v10277_v43 = vand.u32 4294901760, %v10199_v52  ;;  %v12764_v31 = vpop.f32.mrf.mxu0  ;;  %v12789_v1 = vpop.f32.mrf.mxu1 }
 0x52d   :  { %v11312_v1 = vand.u32 4294901760, %v11311_v13 }
 0x52e   :  { %v10278_v45 = vsub.f32 %v10199_v52, %v10277_v43  ;;  %v8113_v57 = vpop.f32.mrf.mxu0  ;;  %12918 = vmatmul.mubr.f32.vlgmr.msra.gmra.mxu1 %v10277_v43 }
 0x52f   :  { %v8114_v19 = vadd.f32 %v8113_v57, %v8040_v55  ;;  %12927 = vmatprep.mubr.f32.mxu1 %v10269_v27  ;;  %12926 = vmatpush3.msra.mxu1 %v14300_v23 }
 0x530   :  { %v10279_v21 = vand.u32 4294901760, %v10278_v45  ;;  %v12774_v36 = vpop.f32.mrf.mxu0  ;;  %12935 = vmatprep.subr.mxu1 %v14300_v23 }
 0x531   :  { %v8188_v26 = vadd.f32 %v8187_v34, %v8114_v19 }
 0x532   :  { %v10280_v41 = vsub.f32 %v10278_v45, %v10279_v21  ;;  %v8261_v3 = vpop.f32.mrf.mxu0  ;;  %12928 = vmatmul.mubr.f32.vlgmr.msra.gmra.mxu1 %v10279_v21 }
 0x533   :  { %v8262_v7 = vadd.f32 %v8261_v3, %v8188_v26  ;;  %12937 = vmatprep.mubr.f32.mxu1 %v14322_v11  ;;  %12936 = vmatpush3.msra.mxu1 %v14300_v23 }
 0x534   :  { %v10281_v39 = vand.u32 4294901760, %v10280_v41  ;;  %v12784_v37 = vpop.f32.mrf.mxu0  ;;  %12945 = vmatprep.subr.mxu1 %v10817_v56 }
 0x535   :  { %v8334_v50 = vadd.f32 %v8333_v51, %v8262_v7 }
 0x536   :  { %12913 = vmatmul.mubr.f32.vlgmr.msra.gmra.mxu0 %v10281_v39  ;;  %12938 = vmatmul.mubr.f32.vlgmr.msra.gmra.mxu1 %v10277_v43 }
 0x537   :  { %v10691_v59 = vsel %vm2314_vm2, %v8334_v50, 0  ;;  %12922 = vmatprep.mubr.f32.mxu0 %v10268_v17  ;;  %12921 = vmatpush3.msra.mxu0 %v14303_v44 }
 0x538   :  { %v14343_v60 = vand.u32 4294901760, %v10691_v59  ;;  %12930 = vmatprep.subr.mxu0 %v14306_v8  ;;  %12946 = vmatpush3.msra.mxu1 %v10817_v56 }
 0x539   :  { %12955 = vmatprep.subr.mxu1 %v14324_v42 }
 0x53a   :  { %v14348_v23 = vsub.f32 %v10691_v59, %v14343_v60  ;;  %12923 = vmatmul.mubr.f32.vlgmr.msra.gmra.mxu0 %v10278_v45  ;;  %12947 = vmatprep.mubr.f32.mxu1 %v14343_v60 }
 0x53b   :  { %12932 = vmatprep.mubr.f32.mxu0 %v14322_v11  ;;  %12931 = vmatpush3.msra.mxu0 %v14306_v8 }
 0x53c   :  { %v10764_v53 = vand.u32 4294901760, %v14348_v23  ;;  %12940 = vmatprep.subr.mxu0 %v14324_v42 }
 0x53e   :  { %12933 = vmatmul.mubr.f32.vlgmr.msra.gmra.mxu0 %v10277_v43  ;;  %v10765_v44 = vsub.f32 %v14348_v23, %v10764_v53 }
 0x53f   :  { %12941 = vmatpush3.msra.mxu0 %v14324_v42 }
 0x540   :  { %v10766_v63 = vand.u32 4294901760, %v10765_v44  ;;  %12950 = vmatprep.subr.mxu0 %v14329_v29 }
 0x542   :  { %12942 = vmatprep.mubr.f32.mxu0 %v10766_v63 }
 0x546   :  { %v8492_v28 = vpop.f32.mrf.mxu1 }
 0x548   :  { %v12799_v0 = vpop.f32.mrf.mxu1 }
 0x54a   :  { %v8640_v35 = vpop.f32.mrf.mxu1 }
 0x54c   :  { %v8416_v46 = vpop.f32.mrf.mxu0  ;;  %v12809_v10 = vpop.f32.mrf.mxu1 }
 0x54d   :  { %v8493_v62 = vadd.f32 %v8492_v28, %v8416_v46 }
 0x54e   :  { %v12794_v8 = vpop.f32.mrf.mxu0  ;;  %v8786_v4 = vpop.f32.mrf.mxu1 }
 0x550   :  { %v8566_v38 = vpop.f32.mrf.mxu0  ;;  %v12819_v5 = vpop.f32.mrf.mxu1 }
 0x551   :  { %v8567_v6 = vadd.f32 %v8566_v38, %v8493_v62 }
 0x552   :  { %v12804_v33 = vpop.f32.mrf.mxu0  ;;  %v8945_v11 = vpop.f32.mrf.mxu1 }
 0x553   :  { %v8641_v12 = vadd.f32 %v8640_v35, %v8567_v6 }
 0x554   :  { %v8714_v16 = vpop.f32.mrf.mxu0  ;;  %v12829_v17 = vpop.f32.mrf.mxu1 }
 0x555   :  { %v8715_v47 = vadd.f32 %v8714_v16, %v8641_v12 }
 0x556   :  { %v12814_v18 = vpop.f32.mrf.mxu0  ;;  %v9093_v20 = vpop.f32.mrf.mxu1 }
 0x557   :  { %v8787_v25 = vadd.f32 %v8786_v4, %v8715_v47 }
 0x558   :  { %v8869_v27 = vpop.f32.mrf.mxu0  ;;  %v12839_v30 = vpop.f32.mrf.mxu1 }
 0x559   :  { %v10694_v32 = vsel %vm2314_vm2, %v8787_v25, 0  ;;  %v8946_v40 = vadd.f32 %v8945_v11, %v8869_v27 }
 0x55a   :  { %v10772_v34 = vand.u32 4294901760, %v10694_v32  ;;  %v12824_v58 = vpop.f32.mrf.mxu0  ;;  %v9239_v24 = vpop.f32.mrf.mxu1 }
 0x55c   :  { %v10773_v48 = vsub.f32 %v10694_v32, %v10772_v34  ;;  %v9019_v49 = vpop.f32.mrf.mxu0  ;;  %12948 = vmatmul.mubr.f32.vlgmr.msra.gmra.mxu1 %v10772_v34  ;;  %v12849_v61 = vpop.f32.mrf.mxu1 }
 0x55d   :  { %v9020_v51 = vadd.f32 %v9019_v49, %v8946_v40  ;;  %12957 = vmatprep.mubr.f32.mxu1 %v10764_v53  ;;  %12956 = vmatpush3.msra.mxu1 %v14324_v42 }
 0x55e   :  { %v10774_v52 = vand.u32 4294901760, %v10773_v48  ;;  %v12834_v43 = vpop.f32.mrf.mxu0  ;;  %v9398_v31 = vpop.f32.mrf.mxu1  ;;  %12965 = vmatprep.subr.mxu1 %v14324_v42 }
 0x55f   :  { %v9094_v54 = vadd.f32 %v9093_v20, %v9020_v51 }
 0x560   :  { %v10775_v55 = vsub.f32 %v10773_v48, %v10774_v52  ;;  %v9167_v45 = vpop.f32.mrf.mxu0  ;;  %12958 = vmatmul.mubr.f32.vlgmr.msra.gmra.mxu1 %v10774_v52  ;;  %v12859_v57 = vpop.f32.mrf.mxu1 }
 0x561   :  { %v9168_v19 = vadd.f32 %v9167_v45, %v9094_v54  ;;  %12967 = vmatprep.mubr.f32.mxu1 %v14343_v60  ;;  %12966 = vmatpush3.msra.mxu1 %v14324_v42 }
 0x562   :  { %v10776_v21 = vand.u32 4294901760, %v10775_v55  ;;  %v12844_v36 = vpop.f32.mrf.mxu0  ;;  %v9546_v56 = vpop.f32.mrf.mxu1  ;;  %12975 = vmatprep.subr.mxu1 %v11312_v1 }
 0x563   :  { %v9240_v26 = vadd.f32 %v9239_v24, %v9168_v19 }
 0x564   :  { %v9322_v41 = vpop.f32.mrf.mxu0  ;;  %12943 = vmatmul.mubr.f32.vlgmr.msra.gmra.mxu0 %v10776_v21  ;;  %12968 = vmatmul.mubr.f32.vlgmr.msra.gmra.mxu1 %v10772_v34  ;;  %v12869_v3 = vpop.f32.mrf.mxu1 }
 0x565   :  { %v11186_v7 = vsel %vm2314_vm2, %v9240_v26, 0  ;;  %12952 = vmatprep.mubr.f32.mxu0 %v14348_v23  ;;  %12951 = vmatpush3.msra.mxu0 %v14329_v29  ;;  %v9399_v42 = vadd.f32 %v9398_v31, %v9322_v41 }
 0x566   :  { %v11257_v39 = vand.u32 4294901760, %v11186_v7  ;;  %v12854_v37 = vpop.f32.mrf.mxu0  ;;  %v9692_v50 = vpop.f32.mrf.mxu1  ;;  %12960 = vmatprep.subr.mxu0 %v14332_v9  ;;  %12976 = vmatpush3.msra.mxu1 %v11312_v1 }
 0x567   :  { %12985 = vmatprep.subr.mxu1 %v14358_v15 }
 0x568   :  { %v11258_v59 = vsub.f32 %v11186_v7, %v11257_v39  ;;  %v9472_v53 = vpop.f32.mrf.mxu0  ;;  %12953 = vmatmul.mubr.f32.vlgmr.msra.gmra.mxu0 %v10773_v48  ;;  %12977 = vmatprep.mubr.f32.mxu1 %v11257_v39  ;;  %v12879_v44 = vpop.f32.mrf.mxu1 }
 0x569   :  { %v9473_v63 = vadd.f32 %v9472_v53, %v9399_v42  ;;  %12962 = vmatprep.mubr.f32.mxu0 %v14343_v60  ;;  %12961 = vmatpush3.msra.mxu0 %v14332_v9 }
 0x56a   :  { %v12864_v29 = vpop.f32.mrf.mxu0  ;;  %v11259_v23 = vand.u32 4294901760, %v11258_v59  ;;  %12970 = vmatprep.subr.mxu0 %v14358_v15 }
 0x56b   :  { %v9547_v28 = vadd.f32 %v9546_v56, %v9473_v63 }
 0x56c   :  { %v9620_v0 = vpop.f32.mrf.mxu0  ;;  %12963 = vmatmul.mubr.f32.vlgmr.msra.gmra.mxu0 %v10772_v34  ;;  %v11260_v35 = vsub.f32 %v11258_v59, %v11259_v23 }
 0x56d   :  { %v9621_v2 = vadd.f32 %v9620_v0, %v9547_v28  ;;  %12971 = vmatpush3.msra.mxu0 %v14358_v15 }
 0x56e   :  { %v12874_v46 = vpop.f32.mrf.mxu0  ;;  %v11261_v10 = vand.u32 4294901760, %v11260_v35  ;;  %12980 = vmatprep.subr.mxu0 %v14361_v14 }
 0x56f   :  { %v9693_v8 = vadd.f32 %v9692_v50, %v9621_v2 }
 0x570   :  { %12972 = vmatprep.mubr.f32.mxu0 %v11261_v10 }
 0x571   :  { %v11189_v60 = vsel %vm2314_vm2, %v9693_v8, 0 }
 0x572   :  { %v11267_v9 = vand.u32 4294901760, %v11189_v60 }
 0x574   :  { %v11268_v4 = vsub.f32 %v11189_v60, %v11267_v9  ;;  %12978 = vmatmul.mubr.f32.vlgmr.msra.gmra.mxu1 %v11267_v9 }
 0x575   :  { %12987 = vmatprep.mubr.f32.mxu1 %v11259_v23  ;;  %12986 = vmatpush3.msra.mxu1 %v14358_v15 }
 0x576   :  { %v11269_v62 = vand.u32 4294901760, %v11268_v4  ;;  %12995 = vmatprep.subr.mxu1 %v14358_v15 }
 0x578   :  { %v11270_v38 = vsub.f32 %v11268_v4, %v11269_v62  ;;  %12988 = vmatmul.mubr.f32.vlgmr.msra.gmra.mxu1 %v11269_v62 }
 0x579   :  { %12997 = vmatprep.mubr.f32.mxu1 %v11257_v39  ;;  %12996 = vmatpush3.msra.mxu1 %v14358_v15 }
 0x57a   :  { %v11271_v5 = vand.u32 4294901760, %v11270_v38 }
 0x57c   :  { %12973 = vmatmul.mubr.f32.vlgmr.msra.gmra.mxu0 %v11271_v5  ;;  %12998 = vmatmul.mubr.f32.vlgmr.msra.gmra.mxu1 %v11267_v9 }
 0x57d   :  { %12981 = vmatpush3.msra.mxu0 %v14361_v14  ;;  %12982 = vmatprep.mubr.f32.mxu0 %v11258_v59 }
 0x57e   :  { %12990 = vmatprep.subr.mxu0 %v14364_v22 }
 0x580   :  { %12983 = vmatmul.mubr.f32.vlgmr.msra.gmra.mxu0 %v11268_v4 }
 0x581   :  { %12991 = vmatpush3.msra.mxu0 %v14364_v22  ;;  %12992 = vmatprep.mubr.f32.mxu0 %v11257_v39 }
 0x584   :  { %12993 = vmatmul.mubr.f32.vlgmr.msra.gmra.mxu0 %v11267_v9 }
 0x5b5   :  { %v12889_v6 = vpop.f32.mrf.mxu1 }
 0x5b7   :  { %v9864_v33 = vpop.f32.mrf.mxu1 }
 0x5b9   :  { %v12899_v11 = vpop.f32.mrf.mxu1 }
 0x5bb   :  { %v10025_v16 = vpop.f32.mrf.mxu1 }
 0x5bd   :  { %v12884_v12 = vpop.f32.mrf.mxu0  ;;  %v12909_v15 = vpop.f32.mrf.mxu1 }
 0x5be   :  { %v9871_v19 = vadd.f32 %v12889_v6, %v12884_v12 }
 0x5bf   :  { %v9778_v17 = vpop.f32.mrf.mxu0  ;;  %v14390_v18 = vpop.f32.mrf.mxu1 }
 0x5c0   :  { %v9865_v3 = vadd.f32 %v9864_v33, %v9778_v17 }
 0x5c1   :  { %v12894_v47 = vpop.f32.mrf.mxu0 }
 0x5c2   :  { %v9952_v7 = vadd.f32 %v12894_v47, %v9871_v19  ;;  %v11727_v19 = vld [vmem:[%s14418_s6] ss:$0 sm:$0xff] }
 0x5c3   :  { %v9944_v20 = vpop.f32.mrf.mxu0 }
 0x5c4   :  { %v9945_v59 = vadd.f32 %v9944_v20, %v9865_v3  ;;  %v10034_v29 = vadd.f32 %v12899_v11, %v9952_v7 }
 0x5c5   :  { %v12904_v25 = vpop.f32.mrf.mxu0 }
 0x5c6   :  { %v10026_v35 = vadd.f32 %v10025_v16, %v9945_v59  ;;  %v10114_v8 = vadd.f32 %v12904_v25, %v10034_v29 }
 0x5c7   :  { %v10107_v30 = vpop.f32.mrf.mxu0 }
 0x5c8   :  { %v10108_v38 = vadd.f32 %v10107_v30, %v10026_v35  ;;  %v10192_v17 = vadd.f32 %v12909_v15, %v10114_v8 }
 0x5ca   :  { %v11687_v30 = vsel %vm88_vm0, %v10192_v17, 0.0 }
 0x5ee   :  { %v12919_v14 = vpop.f32.mrf.mxu1 }
 0x5f0   :  { %v10359_v27 = vpop.f32.mrf.mxu1 }
 0x5f2   :  { %v12929_v32 = vpop.f32.mrf.mxu1 }
 0x5f4   :  { %v10520_v22 = vpop.f32.mrf.mxu1 }
 0x5f6   :  { %v12914_v34 = vpop.f32.mrf.mxu0  ;;  %v12939_v24 = vpop.f32.mrf.mxu1 }
 0x5f7   :  { %v10366_v57 = vadd.f32 %v12919_v14, %v12914_v34 }
 0x5f8   :  { %v10273_v58 = vpop.f32.mrf.mxu0  ;;  %v10680_v40 = vpop.f32.mrf.mxu1 }
 0x5f9   :  { %v10360_v56 = vadd.f32 %v10359_v27, %v10273_v58 }
 0x5fa   :  { %v12924_v13 = vpop.f32.mrf.mxu0 }
 0x5fb   :  { %v10447_v26 = vadd.f32 %v12924_v13, %v10366_v57 }
 0x5fc   :  { %v10439_v48 = vpop.f32.mrf.mxu0 }
 0x5fd   :  { %v10440_v37 = vadd.f32 %v10439_v48, %v10360_v56  ;;  %v10529_v44 = vadd.f32 %v12929_v32, %v10447_v26  ;;  %v10186_v32 = vadd.f32 %v14390_v18, %v10108_v38 }
 0x5fe   :  { %v12934_v61 = vpop.f32.mrf.mxu0 }
 0x5ff   :  { %v10521_v28 = vadd.f32 %v10520_v22, %v10440_v37  ;;  %v10609_v46 = vadd.f32 %v12934_v61, %v10529_v44  ;;  %v11680_v18 = vsel %vm88_vm0, %v10186_v32, 0.0 }
 0x600   :  { %v10602_v52 = vpop.f32.mrf.mxu0 }
 0x601   :  { %v10603_v4 = vadd.f32 %v10602_v52, %v10521_v28  ;;  %v10687_v6 = vadd.f32 %v12939_v24, %v10609_v46 }
 0x603   :  { %v10681_v20 = vadd.f32 %v10680_v40, %v10603_v4  ;;  %v11688_v25 = vsel %vm88_vm0, %v10687_v6, 0.0 }
 0x605   :  { %v11681_v15 = vsel %vm88_vm0, %v10681_v20, 0.0 }
 0x61c   :  { %v12949_v49 = vpop.f32.mrf.mxu1 }
 0x61e   :  { %v10854_v51 = vpop.f32.mrf.mxu1 }
 0x620   :  { %v12959_v43 = vpop.f32.mrf.mxu1 }
 0x622   :  { %v11015_v1 = vpop.f32.mrf.mxu1 }
 0x624   :  { %v12944_v31 = vpop.f32.mrf.mxu0  ;;  %v12969_v55 = vpop.f32.mrf.mxu1 }
 0x625   :  { %v10861_v41 = vadd.f32 %v12949_v49, %v12944_v31 }
 0x626   :  { %v10768_v54 = vpop.f32.mrf.mxu0  ;;  %v11175_v21 = vpop.f32.mrf.mxu1 }
 0x627   :  { %v10855_v50 = vadd.f32 %v10854_v51, %v10768_v54  ;;  %v11689_v51 = vadd.f32 %v11688_v25, %v11687_v30  ;;  %v11682_v54 = vadd.f32 %v11681_v15, %v11680_v18 }
 0x628   :  { %v12954_v45 = vpop.f32.mrf.mxu0 }
 0x629   :  { %v10942_v42 = vadd.f32 %v12954_v45, %v10861_v41 }
 0x62a   :  { %v10934_v36 = vpop.f32.mrf.mxu0 }
 0x62b   :  { %v10935_v63 = vadd.f32 %v10934_v36, %v10855_v50  ;;  %v11024_v0 = vadd.f32 %v12959_v43, %v10942_v42 }
 0x62c   :  { %v12964_v53 = vpop.f32.mrf.mxu0 }
 0x62d   :  { %v11016_v10 = vadd.f32 %v11015_v1, %v10935_v63  ;;  %v11104_v62 = vadd.f32 %v12964_v53, %v11024_v0 }
 0x62e   :  { %v11097_v2 = vpop.f32.mrf.mxu0 }
 0x62f   :  { %v11098_v33 = vadd.f32 %v11097_v2, %v11016_v10  ;;  %v11182_v14 = vadd.f32 %v12969_v55, %v11104_v62 }
 0x631   :  { %v11176_v22 = vadd.f32 %v11175_v21, %v11098_v33  ;;  %v11690_v49 = vsel %vm88_vm0, %v11182_v14, 0.0 }
 0x632   :  { %v11691_v55 = vadd.f32 %v11690_v49, %v11689_v51 }
 0x633   :  { %v11683_v43 = vsel %vm88_vm0, %v11176_v22, 0.0 }
 0x634   :  { %v12979_v39 = vpop.f32.mrf.mxu1  ;;  %v11684_v36 = vadd.f32 %v11683_v43, %v11682_v54 }
 0x636   :  { %v11349_v23 = vpop.f32.mrf.mxu1 }
 0x638   :  { %v12989_v60 = vpop.f32.mrf.mxu1 }
 0x63a   :  { %v11510_v47 = vpop.f32.mrf.mxu1 }
 0x63c   :  { %v12974_v9 = vpop.f32.mrf.mxu0  ;;  %v12999_v24 = vpop.f32.mrf.mxu1 }
 0x63d   :  { %v11356_v12 = vadd.f32 %v12979_v39, %v12974_v9 }
 0x63e   :  { %v11263_v5 = vpop.f32.mrf.mxu0  ;;  %v11670_v45 = vpop.f32.mrf.mxu1 }
 0x63f   :  { %v11350_v27 = vadd.f32 %v11349_v23, %v11263_v5 }
 0x640   :  { %v12984_v11 = vpop.f32.mrf.mxu0 }
 0x641   :  { %v11437_v16 = vadd.f32 %v12984_v11, %v11356_v12 }
 0x642   :  { %v11429_v34 = vpop.f32.mrf.mxu0 }
 0x643   :  { %v11430_v58 = vadd.f32 %v11429_v34, %v11350_v27  ;;  %v11519_v13 = vadd.f32 %v12989_v60, %v11437_v16 }
 0x644   :  { %v12994_v48 = vpop.f32.mrf.mxu0 }
 0x645   :  { %v11599_v40 = vadd.f32 %v12994_v48, %v11519_v13  ;;  %v11511_v61 = vadd.f32 %v11510_v47, %v11430_v58 }
 0x646   :  { %v11592_v52 = vpop.f32.mrf.mxu0 }
 0x647   :  { %v11677_v31 = vadd.f32 %v12999_v24, %v11599_v40  ;;  %v11593_v1 = vadd.f32 %v11592_v52, %v11511_v61 }
 0x649   :  { %v11692_v57 = vsel %vm88_vm0, %v11677_v31, 0.0  ;;  %v11671_v21 = vadd.f32 %v11670_v45, %v11593_v1 }
 0x64a   :  { %v11693_v56 = vadd.f32 %v11692_v57, %v11691_v55 }
 0x64b   :  { %v11685_v26 = vsel %vm88_vm0, %v11671_v21, 0.0 }
 0x64c   :  { %v11702_v41 = vadd.f32 %v11727_v19, %v11693_v56  ;;  %v11686_v3 = vadd.f32 %v11685_v26, %v11684_v36 }
 0x64e   :  { %11704 = vst.msk [vmem:[#allocation8 + $0x8] sm:$0xff] %vm88_vm0, %v11702_v41  ;;  %v11701_v7 = vadd.f32 %v11727_v19, %v11686_v3 }
 0x650   :  { %11703 = vst.msk [vmem:[#allocation8] sm:$0xff] %vm88_vm0, %v11701_v7 }
 0x651   :  { %13118 = shalt.err (!%p13115_p5)
}
 0x652   :  { %11716 = dma.vmem_to_hbm [thread:$0]  %s11711_s10, 256, %s14419_s7, [#allocation4], %s13135_s29, %s13135_s29, %s13136_s30  }
 0x653   :  { %13131 = dma.done.wait [#allocation4], 256  }
 0x654   :  { %13132 = vsyncadd [#allocation4], 4294967040 }
 0x655   :  { %11720 = vsyncpa [#allocation3], 1 }
 0x656   :  { %11721 = vsyncpa [#allocation6], 1 }
 0x657   :  { %11722 = vsyncpa [#allocation4], 1 }

</bundles_post_ra>
